<compile_context>
chip_gen: v7x
topology: tpu7x:2x2x1
jax: 0.10.0
libtpu: 0.0.40
codegen_flags: <defaults>
</compile_context>

<pallas_src>
import jax
import jax.numpy as jnp
from jax.experimental import pallas as pl
from jax.experimental.pallas import tpu as pltpu

D_IN = 28 * 28        # 784 (flattened image)
D_H = 512
D_OUT = 10
D_OUT_PAD = 128       # lane-dense output block (one full vreg of lanes)


def _round_up(x, m):
    return (x + m - 1) // m * m


def _mlp_kernel(x_ref, w1_ref, b1_ref, w2_ref, b2_ref, w3_ref, b3_ref, o_ref):
    # x_ref: (TB, 784) f32 (batch-tiled, double-buffered)
    # w*/b*: VMEM-resident (constant index map, single-buffered)
    # o_ref: (TB, 128) bf16 (lane-dense store; cols 10..127 are zero weights)

    # Flatten already done by the wrapper reshape; cast to bf16 in VMEM (VPU).
    x = x_ref[...].astype(jnp.bfloat16)

    # Layer 1: Linear(784 -> 512) + ReLU   (bf16 MXU matmul, f32 accumulation)
    h1 = jnp.dot(x, w1_ref[...], preferred_element_type=jnp.float32)
    h1 = jnp.maximum(h1 + b1_ref[...], 0.0).astype(jnp.bfloat16)

    # Layer 2: Linear(512 -> 512) + ReLU
    h2 = jnp.dot(h1, w2_ref[...], preferred_element_type=jnp.float32)
    h2 = jnp.maximum(h2 + b2_ref[...], 0.0).astype(jnp.bfloat16)

    # Layer 3: Linear(512 -> 10, lane-padded to 128) + ReLU
    h3 = jnp.dot(h2, w3_ref[...], preferred_element_type=jnp.float32)
    o_ref[...] = jnp.maximum(h3 + b3_ref[...], 0.0).astype(o_ref.dtype)


def neural_network_forward(x, params, *, tb_cap=1024, min_grid_steps=8):
    """x: (N, 28, 28) float32. params: f32 (w1,b1,w2,b2,w3,b3), weights (in,out).

    Returns logits (N, 10) float32 (same forward pass as the PyTorch module,
    computed with bf16 inputs/weights and f32 accumulation).
    """
    n = x.shape[0]
    w1, b1, w2, b2, w3, b3 = params

    # ---- glue (plain JAX, no extra HBM pass over x) ------------------------
    # nn.Flatten: contiguous reshape, no copy.  x stays f32; the bf16 cast is
    # fused into the kernel per tile.
    x_flat = x.reshape(n, D_IN)

    # Batch tile: multiple of 16 (bf16 sublane packing).  Grow it to amortize
    # the ~0.35us/step overhead, but keep >= min_grid_steps tiles so v7x's two
    # TensorCores each get several tiles and DMA/compute overlap survives.
    n16 = _round_up(max(n, 1), 16)
    tb = _round_up(pl.cdiv(n16, min_grid_steps), 16)
    tb = max(16, min(tb, tb_cap, n16))
    grid = (pl.cdiv(n, tb),)

    # Weights to bf16 once (tiny vs. x traffic); pad only w3/b3's output lanes
    # to 128 so layer 3 and the store are lane-dense.  Biases stay f32.
    w1_b = w1.astype(jnp.bfloat16)                                   # (784, 512)
    w2_b = w2.astype(jnp.bfloat16)                                   # (512, 512)
    w3_b = jnp.zeros((D_H, D_OUT_PAD), jnp.bfloat16).at[:, :D_OUT].set(
        w3.astype(jnp.bfloat16))                                     # (512, 128)
    b1_r = b1.reshape(1, D_H).astype(jnp.float32)
    b2_r = b2.reshape(1, D_H).astype(jnp.float32)
    b3_r = jnp.zeros((1, D_OUT_PAD), jnp.float32).at[:, :D_OUT].set(
        b3.reshape(1, D_OUT).astype(jnp.float32))

    # Constant block index -> loaded once, VMEM-resident; Buffered(1) avoids a
    # useless second prefetch buffer for these never-changing blocks.
    def resident(arr):
        return pl.BlockSpec(arr.shape, lambda i: (0, 0),
                            pipeline_mode=pl.Buffered(1))

    flops = 2 * n * (D_IN * D_H + D_H * D_H + D_H * D_OUT_PAD)
    bytes_accessed = (
        x_flat.size * 4
        + (w1_b.size + w2_b.size + w3_b.size) * 2
        + (b1_r.size + b2_r.size + b3_r.size) * 4
        + n * D_OUT_PAD * 2)

    out_p = pl.pallas_call(
        _mlp_kernel,
        out_shape=jax.ShapeDtypeStruct((n, D_OUT_PAD), jnp.bfloat16),
        grid=grid,
        in_specs=[
            # x: batch-tiled, f32, full-extent K=784 last dim (no K padding).
            pl.BlockSpec((tb, D_IN), lambda i: (i, 0)),
            resident(w1_b), resident(b1_r),
            resident(w2_b), resident(b2_r),
            resident(w3_b), resident(b3_r),
        ],
        out_specs=pl.BlockSpec((tb, D_OUT_PAD), lambda i: (i, 0)),
        compiler_params=pltpu.CompilerParams(
            dimension_semantics=("parallel",),   # v7x: shard tiles over 2 TCs
            # 32 MiB is safe on every generation (v5e scoped default is only
            # 16 MiB; v7x physical is 64 MiB) and ~2x our worst-case footprint.
            vmem_limit_bytes=32 << 20,
        ),
        cost_estimate=pl.CostEstimate(
            flops=flops, transcendentals=0, bytes_accessed=bytes_accessed),
    )(x_flat, w1_b, b1_r, w2_b, b2_r, w3_b, b3_r)

    # Strip lane padding; cast the tiny (N, 10) result back to f32.
    return out_p[:, :D_OUT].astype(jnp.float32)


def init_params(key):
    """Deterministic init matching PyTorch Linear shapes.

    PyTorch nn.Linear(i, o): weight (o, i), bias (o,). We store weights as
    (i, o) so the kernel does x @ W. Kaiming-uniform-like bounds (1/sqrt(i)).
    """
    dims = [(D_IN, D_H), (D_H, D_H), (D_H, D_OUT)]
    params = []
    for d_in, d_out in dims:
        key, kw, kb = jax.random.split(key, 3)
        bound = 1.0 / jnp.sqrt(jnp.float32(d_in))
        w = jax.random.uniform(kw, (d_in, d_out), jnp.float32, -bound, bound)
        b = jax.random.uniform(kb, (d_out,), jnp.float32, -bound, bound)
        params.extend([w, b])
    return tuple(params)


def _reference(x, params):
    """Plain-JAX f32 reference (same math as the PyTorch module)."""
    w1, b1, w2, b2, w3, b3 = params
    xf = x.reshape(x.shape[0], -1)
    h = jnp.maximum(xf @ w1 + b1, 0.0)
    h = jnp.maximum(h @ w2 + b2, 0.0)
    return jnp.maximum(h @ w3 + b3, 0.0)


if __name__ == "__main__":
    key = jax.random.PRNGKey(0)
    key, kx1, kx2 = jax.random.split(key, 3)
    params = init_params(key)

    fwd = jax.jit(neural_network_forward)

    # Small demo batch (single partial tile).
    x_small = jax.random.uniform(kx1, (2, 28, 28), jnp.float32)
    logits_small = jax.block_until_ready(fwd(x_small, params))
    assert logits_small.shape == (2, D_OUT), logits_small.shape
    assert logits_small.dtype == jnp.float32
    ref_small = _reference(x_small, params)
    # bf16 inputs/weights/store with f32 accumulation -> loosened tolerance.
    assert jnp.allclose(logits_small, ref_small, atol=3e-2, rtol=3e-2)

    # Ragged multi-tile batch (exercises grid > 1 and the partial last tile).
    x_big = jax.random.uniform(kx2, (300, 28, 28), jnp.float32)
    logits_big = jax.block_until_ready(fwd(x_big, params))
    assert logits_big.shape == (300, D_OUT), logits_big.shape
    ref_big = _reference(x_big, params)
    assert jnp.allclose(logits_big, ref_big, atol=3e-2, rtol=3e-2)

    print("KERNEL_OK")
</pallas_src>

<mosaic_0001>
module attributes {stable_mosaic.version = 11 : i64} {
  func.func @_mlp_kernel(%arg0: i32, %arg1: memref<16x784xf32, #tpu.memory_space<vmem>>, %arg2: memref<784x512xbf16, #tpu.memory_space<vmem>>, %arg3: memref<1x512xf32, #tpu.memory_space<vmem>>, %arg4: memref<512x512xbf16, #tpu.memory_space<vmem>>, %arg5: memref<1x512xf32, #tpu.memory_space<vmem>>, %arg6: memref<512x128xbf16, #tpu.memory_space<vmem>>, %arg7: memref<1x128xf32, #tpu.memory_space<vmem>>, %arg8: memref<16x128xbf16, #tpu.memory_space<vmem>>) attributes {dimension_semantics = [#tpu.dimension_semantics<parallel>], iteration_bounds = array<i64: 1>, scalar_prefetch = 0 : i64, scratch_operands = 0 : i64, tpu.core_type = #tpu.core_type<tc>, window_params = [{transform_indices = @transform_0, window_bounds = array<i64: 16, 784>}, {pipeline_mode = #tpu.pipeline_mode<synchronous>, transform_indices = @transform_1, window_bounds = array<i64: 784, 512>}, {pipeline_mode = #tpu.pipeline_mode<synchronous>, transform_indices = @transform_2, window_bounds = array<i64: 1, 512>}, {pipeline_mode = #tpu.pipeline_mode<synchronous>, transform_indices = @transform_3, window_bounds = array<i64: 512, 512>}, {pipeline_mode = #tpu.pipeline_mode<synchronous>, transform_indices = @transform_4, window_bounds = array<i64: 1, 512>}, {pipeline_mode = #tpu.pipeline_mode<synchronous>, transform_indices = @transform_5, window_bounds = array<i64: 512, 128>}, {pipeline_mode = #tpu.pipeline_mode<synchronous>, transform_indices = @transform_6, window_bounds = array<i64: 1, 128>}, {transform_indices = @transform_7, window_bounds = array<i64: 16, 128>}]} {
    %c0 = arith.constant 0 : index
    %c0_0 = arith.constant 0 : index
    %0 = vector.load %arg1[%c0, %c0_0] : memref<16x784xf32, #tpu.memory_space<vmem>>, vector<16x784xf32>
    %1 = arith.truncf %0 : vector<16x784xf32> to vector<16x784xbf16>
    %c0_1 = arith.constant 0 : index
    %c0_2 = arith.constant 0 : index
    %2 = vector.load %arg2[%c0_1, %c0_2] : memref<784x512xbf16, #tpu.memory_space<vmem>>, vector<784x512xbf16>
    %cst = arith.constant dense<0.000000e+00> : vector<16x512xf32>
    %3 = tpu.matmul %1, %2, %cst {dimension_numbers = #tpu.dot_dimension_numbers<[1], [0], [0], [1], [0, 0, 1, 1], [], []>} : vector<16x784xbf16>, vector<784x512xbf16>, vector<16x512xf32> -> vector<16x512xf32>
    %c0_3 = arith.constant 0 : index
    %c0_4 = arith.constant 0 : index
    %4 = vector.load %arg3[%c0_3, %c0_4] : memref<1x512xf32, #tpu.memory_space<vmem>>, vector<1x512xf32>
    %5 = vector.broadcast %4 : vector<1x512xf32> to vector<16x512xf32>
    %6 = arith.addf %3, %5 : vector<16x512xf32>
    %cst_5 = arith.constant 0.000000e+00 : f32
    %7 = vector.broadcast %cst_5 : f32 to vector<16x512xf32>
    %8 = arith.maximumf %6, %7 : vector<16x512xf32>
    %9 = arith.truncf %8 : vector<16x512xf32> to vector<16x512xbf16>
    %c0_6 = arith.constant 0 : index
    %c0_7 = arith.constant 0 : index
    %10 = vector.load %arg4[%c0_6, %c0_7] : memref<512x512xbf16, #tpu.memory_space<vmem>>, vector<512x512xbf16>
    %cst_8 = arith.constant dense<0.000000e+00> : vector<16x512xf32>
    %11 = tpu.matmul %9, %10, %cst_8 {dimension_numbers = #tpu.dot_dimension_numbers<[1], [0], [0], [1], [0, 0, 1, 1], [], []>} : vector<16x512xbf16>, vector<512x512xbf16>, vector<16x512xf32> -> vector<16x512xf32>
    %c0_9 = arith.constant 0 : index
    %c0_10 = arith.constant 0 : index
    %12 = vector.load %arg5[%c0_9, %c0_10] : memref<1x512xf32, #tpu.memory_space<vmem>>, vector<1x512xf32>
    %13 = vector.broadcast %12 : vector<1x512xf32> to vector<16x512xf32>
    %14 = arith.addf %11, %13 : vector<16x512xf32>
    %cst_11 = arith.constant 0.000000e+00 : f32
    %15 = vector.broadcast %cst_11 : f32 to vector<16x512xf32>
    %16 = arith.maximumf %14, %15 : vector<16x512xf32>
    %17 = arith.truncf %16 : vector<16x512xf32> to vector<16x512xbf16>
    %c0_12 = arith.constant 0 : index
    %c0_13 = arith.constant 0 : index
    %18 = vector.load %arg6[%c0_12, %c0_13] : memref<512x128xbf16, #tpu.memory_space<vmem>>, vector<512x128xbf16>
    %cst_14 = arith.constant dense<0.000000e+00> : vector<16x128xf32>
    %19 = tpu.matmul %17, %18, %cst_14 {dimension_numbers = #tpu.dot_dimension_numbers<[1], [0], [0], [1], [0, 0, 1, 1], [], []>} : vector<16x512xbf16>, vector<512x128xbf16>, vector<16x128xf32> -> vector<16x128xf32>
    %c0_15 = arith.constant 0 : index
    %c0_16 = arith.constant 0 : index
    %20 = vector.load %arg7[%c0_15, %c0_16] : memref<1x128xf32, #tpu.memory_space<vmem>>, vector<1x128xf32>
    %21 = vector.broadcast %20 : vector<1x128xf32> to vector<16x128xf32>
    %22 = arith.addf %19, %21 : vector<16x128xf32>
    %cst_17 = arith.constant 0.000000e+00 : f32
    %23 = vector.broadcast %cst_17 : f32 to vector<16x128xf32>
    %24 = arith.maximumf %22, %23 : vector<16x128xf32>
    %25 = arith.truncf %24 : vector<16x128xf32> to vector<16x128xbf16>
    %c0_18 = arith.constant 0 : index
    %c0_19 = arith.constant 0 : index
    %26 = vector.load %arg8[%c0_18, %c0_19] : memref<16x128xbf16, #tpu.memory_space<vmem>>, vector<16x128xbf16>
    tpu.vector_store %arg8[%c0_18, %c0_19], %25 {strides = array<i32>} : memref<16x128xbf16, #tpu.memory_space<vmem>>, vector<16x128xbf16>,
    return
  }
  func.func @transform_0(%arg0: i32) -> (i32, i32) {
    %c0_i32 = arith.constant 0 : i32
    %c0_i32_0 = arith.constant 0 : i32
    return %arg0, %c0_i32 : i32, i32
  }
  func.func @transform_1(%arg0: i32) -> (i32, i32) {
    %c0_i32 = arith.constant 0 : i32
    %c0_i32_0 = arith.constant 0 : i32
    %c0_i32_1 = arith.constant 0 : i32
    return %c0_i32, %c0_i32_0 : i32, i32
  }
  func.func @transform_2(%arg0: i32) -> (i32, i32) {
    %c0_i32 = arith.constant 0 : i32
    %c0_i32_0 = arith.constant 0 : i32
    %c0_i32_1 = arith.constant 0 : i32
    return %c0_i32, %c0_i32_0 : i32, i32
  }
  func.func @transform_3(%arg0: i32) -> (i32, i32) {
    %c0_i32 = arith.constant 0 : i32
    %c0_i32_0 = arith.constant 0 : i32
    %c0_i32_1 = arith.constant 0 : i32
    return %c0_i32, %c0_i32_0 : i32, i32
  }
  func.func @transform_4(%arg0: i32) -> (i32, i32) {
    %c0_i32 = arith.constant 0 : i32
    %c0_i32_0 = arith.constant 0 : i32
    %c0_i32_1 = arith.constant 0 : i32
    return %c0_i32, %c0_i32_0 : i32, i32
  }
  func.func @transform_5(%arg0: i32) -> (i32, i32) {
    %c0_i32 = arith.constant 0 : i32
    %c0_i32_0 = arith.constant 0 : i32
    %c0_i32_1 = arith.constant 0 : i32
    return %c0_i32, %c0_i32_0 : i32, i32
  }
  func.func @transform_6(%arg0: i32) -> (i32, i32) {
    %c0_i32 = arith.constant 0 : i32
    %c0_i32_0 = arith.constant 0 : i32
    %c0_i32_1 = arith.constant 0 : i32
    return %c0_i32, %c0_i32_0 : i32, i32
  }
  func.func @transform_7(%arg0: i32) -> (i32, i32) {
    %c0_i32 = arith.constant 0 : i32
    %c0_i32_0 = arith.constant 0 : i32
    return %arg0, %c0_i32 : i32, i32
  }
}

</mosaic_0001>

<bundles_post_ra>
// kernel: neural_network_forward.1
= control target key start
LH: loop header
LB: loop body
LE: loop exit
PB: predicated region body
PF: predicated region fallthrough
CT: control target
= control target key end

     0   :  { %v4208_v39 = vmov 1983009808   ;;  %v66_v41 = vlaneseq  ;;  %vm1420_vm0 = vcmask 130048   ;;  %s5457_s0 = inlined_call_operand.vmem [shape: f32[2,784], index: 0, kind: input, shape index: {}]   ;;  %s5458_s1 = inlined_call_operand.vmem [shape: bf16[784,512], index: 1, kind: input, shape index: {}]   ;;  %s5459_s2 = inlined_call_operand.vmem [shape: f32[1,512], index: 2, kind: input, shape index: {}]   ;;  %s5460_s3 = inlined_call_operand.vmem [shape: bf16[512,512], index: 3, kind: input, shape index: {}]   ;;  %s5461_s4 = inlined_call_operand.vmem [shape: f32[1,512], index: 4, kind: input, shape index: {}]   ;;  %s5462_s5 = inlined_call_operand.vmem [shape: bf16[512,128], index: 5, kind: input, shape index: {}]   ;;  %s5463_s6 = inlined_call_operand.vmem [shape: f32[1,128], index: 6, kind: input, shape index: {}]   ;;  %s5464_s7 = inlined_call_operand.vmem [shape: bf16[2,128], index: 7, kind: output, shape index: {}]  }
   0x1   :  { %v3666_v0 = vld [vmem:[%s5458_s1 + $0x4] ss:$16 sps:$4 sm:$0xff]   ;;  %v3668_v1 = vld [vmem:[%s5458_s1 + $0xc] ss:$16 sps:$4 sm:$0xff]   ;;  %v3670_v2 = vld [vmem:[%s5458_s1] ss:$16 sps:$4 sm:$0xff]   ;;  %v64_v40 = vunpack.c.l.s4 %v4208_v39 }
   0x2   :  { %1424 = vmatprep.subr.bf16.mxu0 %v3666_v0  ;;  %v3671_v3 = vld [vmem:[%s5458_s1 + $0x8] ss:$16 sps:$4 sm:$0xff]   ;;  %1596 = vmatprep.subr.bf16.mxu1 %v3668_v1  ;;  %v3672_v4 = vld [vmem:[%s5458_s1 + $0x24] ss:$16 sps:$4 sm:$0xff]   ;;  %v3674_v5 = vld [vmem:[%s5458_s1 + $0x2c] ss:$16 sps:$4 sm:$0xff]  }
   0x3   :  { %1425 = vmatpush1.bf16.msra.mxu0 %v3670_v2  ;;  %1597 = vmatpush1.bf16.msra.mxu1 %v3671_v3  ;;  %v3676_v6 = vld [vmem:[%s5458_s1 + $0x20] ss:$16 sps:$4 sm:$0xff]   ;;  %v3677_v7 = vld [vmem:[%s5458_s1 + $0x28] ss:$16 sps:$4 sm:$0xff]   ;;  %v3678_v8 = vld [vmem:[%s5458_s1 + $0x44] ss:$16 sps:$4 sm:$0xff]   ;;  %v65_v47 = vunpack.c.0.s8 %v64_v40 }
   0x4   :  { %1426 = vmatprep.subr.bf16.mxu0 %v3672_v4  ;;  %1598 = vmatprep.subr.bf16.mxu1 %v3674_v5  ;;  %v3680_v9 = vld [vmem:[%s5458_s1 + $0x4c] ss:$16 sps:$4 sm:$0xff]   ;;  %v3682_v10 = vld [vmem:[%s5458_s1 + $0x40] ss:$16 sps:$4 sm:$0xff]   ;;  %v3683_v11 = vld [vmem:[%s5458_s1 + $0x48] ss:$16 sps:$4 sm:$0xff]  }
   0x5   :  { %v3684_v12 = vld [vmem:[%s5458_s1 + $0x64] ss:$16 sps:$4 sm:$0xff]   ;;  %v3686_v13 = vld [vmem:[%s5458_s1 + $0x6c] ss:$16 sps:$4 sm:$0xff]   ;;  %v3688_v14 = vld [vmem:[%s5458_s1 + $0x60] ss:$16 sps:$4 sm:$0xff]  }
   0x6   :  { %v3689_v15 = vld [vmem:[%s5458_s1 + $0x68] ss:$16 sps:$4 sm:$0xff]   ;;  %v3690_v16 = vld [vmem:[%s5458_s1 + $0x84] ss:$16 sps:$4 sm:$0xff]   ;;  %v3692_v17 = vld [vmem:[%s5458_s1 + $0x8c] ss:$16 sps:$4 sm:$0xff]  }
   0x7   :  { %1427 = vmatpush1.bf16.msra.mxu0 %v3676_v6  ;;  %1599 = vmatpush1.bf16.msra.mxu1 %v3677_v7  ;;  %v3694_v18 = vld [vmem:[%s5458_s1 + $0x80] ss:$16 sps:$4 sm:$0xff]   ;;  %v3695_v19 = vld [vmem:[%s5458_s1 + $0x88] ss:$16 sps:$4 sm:$0xff]   ;;  %v3696_v20 = vld [vmem:[%s5458_s1 + $0xa4] ss:$16 sps:$4 sm:$0xff]  }
   0x8   :  { %1428 = vmatprep.subr.bf16.mxu0 %v3678_v8  ;;  %1600 = vmatprep.subr.bf16.mxu1 %v3680_v9  ;;  %v3698_v21 = vld [vmem:[%s5458_s1 + $0xac] ss:$16 sps:$4 sm:$0xff]   ;;  %v3700_v22 = vld [vmem:[%s5458_s1 + $0xa0] ss:$16 sps:$4 sm:$0xff]   ;;  %v3701_v23 = vld [vmem:[%s5458_s1 + $0xa8] ss:$16 sps:$4 sm:$0xff]  }
   0x9   :  { %v3702_v24 = vld [vmem:[%s5458_s1 + $0xc4] ss:$16 sps:$4 sm:$0xff]   ;;  %v3704_v25 = vld [vmem:[%s5458_s1 + $0xcc] ss:$16 sps:$4 sm:$0xff]   ;;  %v3706_v26 = vld [vmem:[%s5458_s1 + $0xc0] ss:$16 sps:$4 sm:$0xff]  }
   0xa   :  { %v3707_v27 = vld [vmem:[%s5458_s1 + $0xc8] ss:$16 sps:$4 sm:$0xff]   ;;  %v3708_v28 = vld [vmem:[%s5458_s1 + $0xe4] ss:$16 sps:$4 sm:$0xff]   ;;  %v3710_v29 = vld [vmem:[%s5458_s1 + $0xec] ss:$16 sps:$4 sm:$0xff]  }
   0xb   :  { %1429 = vmatpush1.bf16.msra.mxu0 %v3682_v10  ;;  %1601 = vmatpush1.bf16.msra.mxu1 %v3683_v11  ;;  %v3712_v30 = vld [vmem:[%s5458_s1 + $0xe0] ss:$16 sps:$4 sm:$0xff]   ;;  %v3713_v31 = vld [vmem:[%s5458_s1 + $0xe8] ss:$16 sps:$4 sm:$0xff]   ;;  %v3714_v32 = vld [vmem:[%s5458_s1 + $0x104] ss:$16 sps:$4 sm:$0xff]  }
   0xc   :  { %1430 = vmatprep.subr.bf16.mxu0 %v3684_v12  ;;  %1602 = vmatprep.subr.bf16.mxu1 %v3686_v13  ;;  %v3716_v33 = vld [vmem:[%s5458_s1 + $0x10c] ss:$16 sps:$4 sm:$0xff]   ;;  %v3718_v34 = vld [vmem:[%s5458_s1 + $0x100] ss:$16 sps:$4 sm:$0xff]   ;;  %v3719_v35 = vld [vmem:[%s5458_s1 + $0x108] ss:$16 sps:$4 sm:$0xff]  }
   0xd   :  { %v3720_v36 = vld [vmem:[%s5458_s1 + $0x124] ss:$16 sps:$4 sm:$0xff]   ;;  %v3722_v37 = vld [vmem:[%s5458_s1 + $0x12c] ss:$16 sps:$4 sm:$0xff]   ;;  %v3724_v38 = vld [vmem:[%s5458_s1 + $0x120] ss:$16 sps:$4 sm:$0xff]  }
   0xe   :  { %v3725_v42 = vld [vmem:[%s5458_s1 + $0x128] ss:$16 sps:$4 sm:$0xff]   ;;  %v3726_v43 = vld [vmem:[%s5458_s1 + $0x144] ss:$16 sps:$4 sm:$0xff]   ;;  %v3728_v44 = vld [vmem:[%s5458_s1 + $0x14c] ss:$16 sps:$4 sm:$0xff]  }
   0xf   :  { %1431 = vmatpush1.bf16.msra.mxu0 %v3688_v14  ;;  %1603 = vmatpush1.bf16.msra.mxu1 %v3689_v15  ;;  %v3730_v45 = vld [vmem:[%s5458_s1 + $0x140] ss:$16 sps:$4 sm:$0xff]   ;;  %v3731_v46 = vld [vmem:[%s5458_s1 + $0x148] ss:$16 sps:$4 sm:$0xff]   ;;  %v4383_v48 = vshrl.u32 %v66_v41, 7 }
  0x10   :  { %1432 = vmatprep.subr.bf16.mxu0 %v3690_v16  ;;  %1604 = vmatprep.subr.bf16.mxu1 %v3692_v17  ;;  %v3732_v49 = vld [vmem:[%s5458_s1 + $0x164] ss:$16 sps:$4 sm:$0xff]   ;;  %v3734_v50 = vld [vmem:[%s5458_s1 + $0x16c] ss:$16 sps:$4 sm:$0xff]   ;;  %v3736_v51 = vld [vmem:[%s5458_s1 + $0x160] ss:$16 sps:$4 sm:$0xff]  }
  0x11   :  { %v3737_v52 = vld [vmem:[%s5458_s1 + $0x168] ss:$16 sps:$4 sm:$0xff]   ;;  %v3738_v53 = vld [vmem:[%s5458_s1 + $0x184] ss:$16 sps:$4 sm:$0xff]   ;;  %v4401_v54 = vsub.s32 %v65_v47, %v4383_v48  ;;  %v3740_v55 = vld [vmem:[%s5458_s1 + $0x18c] ss:$16 sps:$4 sm:$0xff]  }
  0x12   :  { %v3762_v56 = vld [vmem:[%s5457_s0] ss:$14 sps:$4 sm:$0xff]   ;;  %v3765_v57 = vld [vmem:[%s5457_s0 + $0x1c] ss:$14 sps:$4 sm:$0xff]   ;;  %v3768_v58 = vld [vmem:[%s5457_s0 + $0x38] ss:$14 sps:$4 sm:$0xff]  }
  0x13   :  { %1433 = vmatpush1.bf16.msra.mxu0 %v3694_v18  ;;  %1605 = vmatpush1.bf16.msra.mxu1 %v3695_v19  ;;  %v3742_v59 = vld [vmem:[%s5458_s1 + $0x180] ss:$16 sps:$4 sm:$0xff]   ;;  %v3743_v60 = vld [vmem:[%s5458_s1 + $0x188] ss:$16 sps:$4 sm:$0xff]   ;;  %v69_v61 = vrot.slane %v3762_v56, %v4401_v54  ;;  %v3744_v63 = vld [vmem:[%s5458_s1 + $0x1a4] ss:$16 sps:$4 sm:$0xff]   ;;  %v83_v0 = vrot.slane %v3765_v57, %v4401_v54  ;;  %v140_v1 = vrot.slane %v3768_v58, %v4401_v54 }
  0x14   :  { %1434 = vmatprep.subr.bf16.mxu0 %v3696_v20  ;;  %1606 = vmatprep.subr.bf16.mxu1 %v3698_v21  ;;  %v3771_v62 = vld [vmem:[%s5457_s0 + $0x54] ss:$14 sps:$4 sm:$0xff]   ;;  %v3746_v2 = vld [vmem:[%s5458_s1 + $0x1ac] ss:$16 sps:$4 sm:$0xff]   ;;  %v3749_v5 = vld [vmem:[%s5458_s1 + $0x1a8] ss:$16 sps:$4 sm:$0xff]  }
  0x15   :  { %v154_v3 = vrot.slane %v3771_v62, %v4401_v54  ;;  %v3748_v4 = vld [vmem:[%s5458_s1 + $0x1a0] ss:$16 sps:$4 sm:$0xff]   ;;  %v92_v6 = vcombine.high %v69_v61, %v83_v0  ;;  %v3750_v7 = vld [vmem:[%s5458_s1 + $0x1c4] ss:$16 sps:$4 sm:$0xff]   ;;  %v3752_v8 = vld [vmem:[%s5458_s1 + $0x1cc] ss:$16 sps:$4 sm:$0xff]  }
  0x16   :  { %v3764_v10 = vld [vmem:[%s5457_s0 + $0x4] ss:$14 sps:$4 sm:$0xff]   ;;  %v3767_v11 = vld [vmem:[%s5457_s0 + $0x20] ss:$14 sps:$4 sm:$0xff]   ;;  %v3770_v13 = vld [vmem:[%s5457_s0 + $0x3c] ss:$14 sps:$4 sm:$0xff]  }
  0x17   :  { %1435 = vmatpush1.bf16.msra.mxu0 %v3700_v22  ;;  %1607 = vmatpush1.bf16.msra.mxu1 %v3701_v23  ;;  %v163_v9 = vcombine.high %v140_v1, %v154_v3  ;;  %v3773_v14 = vld [vmem:[%s5457_s0 + $0x58] ss:$14 sps:$4 sm:$0xff]   ;;  %v3754_v15 = vld [vmem:[%s5458_s1 + $0x1c0] ss:$16 sps:$4 sm:$0xff]   ;;  %v3758_v18 = vld [vmem:[%s5458_s1 + $0x1ec] ss:$16 sps:$4 sm:$0xff]   ;;  %v4471_v19 = vrot.slane %v3764_v10, %v4401_v54  ;;  %v4474_v20 = vrot.slane %v3767_v11, %v4401_v54 }
  0x18   :  { %1436 = vmatprep.subr.bf16.mxu0 %v3702_v24  ;;  %1608 = vmatprep.subr.bf16.mxu1 %v3704_v25  ;;  %v3755_v16 = vld [vmem:[%s5458_s1 + $0x1c8] ss:$16 sps:$4 sm:$0xff]   ;;  %v3756_v17 = vld [vmem:[%s5458_s1 + $0x1e4] ss:$16 sps:$4 sm:$0xff]   ;;  %v4477_v21 = vrot.slane %v3770_v13, %v4401_v54  ;;  %v4480_v22 = vrot.slane %v3773_v14, %v4401_v54  ;;  %v3760_v23 = vld [vmem:[%s5458_s1 + $0x1e0] ss:$16 sps:$4 sm:$0xff]   ;;  %v91_v25 = vcombine.low %v69_v61, %v83_v0 }
  0x19   :  { %v216_v12 = vpack.c.bf16 %v163_v9, %v92_v6  ;;  %v3761_v24 = vld [vmem:[%s5458_s1 + $0x1e8] ss:$16 sps:$4 sm:$0xff]   ;;  %v3788_v39 = vld [vmem:[%s5458_s1 + $0x244] ss:$16 sps:$4 sm:$0xff]   ;;  %v3791_v40 = vld [vmem:[%s5458_s1 + $0x24c] ss:$16 sps:$4 sm:$0xff]  }
  0x1a   :  { %v3786_v41 = vld [vmem:[%s5458_s1 + $0x240] ss:$16 sps:$4 sm:$0xff]   ;;  %v3800_v47 = vld [vmem:[%s5458_s1 + $0x284] ss:$16 sps:$4 sm:$0xff]   ;;  %v3807_v56 = vld [vmem:[%s5458_s1 + $0x2a8] ss:$16 sps:$4 sm:$0xff]  }
  0x1b   :  { %1437 = vmatpush1.bf16.msra.mxu0 %v3706_v26  ;;  %1609 = vmatpush1.bf16.msra.mxu1 %v3707_v27  ;;  %v162_v26 = vcombine.low %v140_v1, %v154_v3  ;;  %v3776_v27 = vld [vmem:[%s5458_s1 + $0x204] ss:$16 sps:$4 sm:$0xff]   ;;  %v3815_v58 = vld [vmem:[%s5458_s1 + $0x2cc] ss:$16 sps:$4 sm:$0xff]   ;;  %v3819_v0 = vld [vmem:[%s5458_s1 + $0x2e8] ss:$16 sps:$4 sm:$0xff]  }
  0x1c   :  { %1438 = vmatprep.subr.bf16.mxu0 %v3708_v28  ;;  %1610 = vmatprep.subr.bf16.mxu1 %v3710_v29  ;;  %v3779_v28 = vld [vmem:[%s5458_s1 + $0x20c] ss:$16 sps:$4 sm:$0xff]   ;;  %v94_v29 = vcombine.high %v4471_v19, %v4474_v20  ;;  %v3812_v57 = vld [vmem:[%s5458_s1 + $0x2c4] ss:$16 sps:$4 sm:$0xff]   ;;  %v3822_v3 = vld [vmem:[%s5458_s1 + $0x300] ss:$16 sps:$4 sm:$0xff]  }
  0x1d   :  { %1456 = vmatprep.mubr.bf16.mxu0 %v216_v12  ;;  %1628 = vmatprep.mubr.bf16.mxu1 %v216_v12  ;;  %v3818_v61 = vld [vmem:[%s5458_s1 + $0x2e4] ss:$16 sps:$4 sm:$0xff]   ;;  %v3821_v62 = vld [vmem:[%s5458_s1 + $0x2ec] ss:$16 sps:$4 sm:$0xff]   ;;  %v3834_v11 = vld [vmem:[%s5458_s1 + $0x340] ss:$16 sps:$4 sm:$0xff]  }
  0x1e   :  { %v3824_v1 = vld [vmem:[%s5458_s1 + $0x304] ss:$16 sps:$4 sm:$0xff]   ;;  %v3833_v6 = vld [vmem:[%s5458_s1 + $0x32c] ss:$16 sps:$4 sm:$0xff]   ;;  %v3837_v12 = vld [vmem:[%s5458_s1 + $0x348] ss:$16 sps:$4 sm:$0xff]  }
  0x1f   :  { %1439 = vmatpush1.bf16.msra.mxu0 %v3712_v30  ;;  %1611 = vmatpush1.bf16.msra.mxu1 %v3713_v31  ;;  %v165_v30 = vcombine.high %v4477_v21, %v4480_v22  ;;  %v3774_v31 = vld [vmem:[%s5458_s1 + $0x200] ss:$16 sps:$4 sm:$0xff]   ;;  %v3836_v9 = vld [vmem:[%s5458_s1 + $0x344] ss:$16 sps:$4 sm:$0xff]   ;;  %v3839_v10 = vld [vmem:[%s5458_s1 + $0x34c] ss:$16 sps:$4 sm:$0xff]  }
  0x20   :  { %1440 = vmatprep.subr.bf16.mxu0 %v3714_v32  ;;  %1612 = vmatprep.subr.bf16.mxu1 %v3716_v33  ;;  %v3777_v32 = vld [vmem:[%s5458_s1 + $0x208] ss:$16 sps:$4 sm:$0xff]   ;;  %v215_v33 = vpack.c.bf16 %v162_v26, %v91_v25  ;;  %v3842_v13 = vld [vmem:[%s5458_s1 + $0x364] ss:$16 sps:$4 sm:$0xff]   ;;  %v3845_v14 = vld [vmem:[%s5458_s1 + $0x36c] ss:$16 sps:$4 sm:$0xff]  }
  0x21   :  { %v3854_v25 = vld [vmem:[%s5458_s1 + $0x3a4] ss:$16 sps:$4 sm:$0xff]   ;;  %v3857_v26 = vld [vmem:[%s5458_s1 + $0x3ac] ss:$16 sps:$4 sm:$0xff]  }
  0x23   :  { %1441 = vmatpush1.bf16.msra.mxu0 %v3718_v34  ;;  %1613 = vmatpush1.bf16.msra.mxu1 %v3719_v35  ;;  %v3782_v34 = vld [vmem:[%s5458_s1 + $0x224] ss:$16 sps:$4 sm:$0xff]   ;;  %v3785_v35 = vld [vmem:[%s5458_s1 + $0x22c] ss:$16 sps:$4 sm:$0xff]  }
  0x24   :  { %1442 = vmatprep.subr.bf16.mxu0 %v3720_v36  ;;  %1614 = vmatprep.subr.bf16.mxu1 %v3722_v37  ;;  %v218_v36 = vpack.c.bf16 %v165_v30, %v94_v29  ;;  %v3780_v37 = vld [vmem:[%s5458_s1 + $0x220] ss:$16 sps:$4 sm:$0xff]   ;;  %v3860_v29 = vld [vmem:[%s5458_s1 + $0x3c4] ss:$16 sps:$4 sm:$0xff]   ;;  %v3863_v30 = vld [vmem:[%s5458_s1 + $0x3cc] ss:$16 sps:$4 sm:$0xff]  }
  0x27   :  { %1443 = vmatpush1.bf16.msra.mxu0 %v3724_v38  ;;  %1615 = vmatpush1.bf16.msra.mxu1 %v3725_v42  ;;  %v3783_v38 = vld [vmem:[%s5458_s1 + $0x228] ss:$16 sps:$4 sm:$0xff]  }
  0x28   :  { %1444 = vmatprep.subr.bf16.mxu0 %v3726_v43  ;;  %1616 = vmatprep.subr.bf16.mxu1 %v3728_v44  ;;  %v3789_v42 = vld [vmem:[%s5458_s1 + $0x248] ss:$16 sps:$4 sm:$0xff]   ;;  %v3794_v43 = vld [vmem:[%s5458_s1 + $0x264] ss:$16 sps:$4 sm:$0xff]   ;;  %v3797_v44 = vld [vmem:[%s5458_s1 + $0x26c] ss:$16 sps:$4 sm:$0xff]  }
  0x2b   :  { %1445 = vmatpush1.bf16.msra.mxu0 %v3730_v45  ;;  %1617 = vmatpush1.bf16.msra.mxu1 %v3731_v46  ;;  %v3792_v45 = vld [vmem:[%s5458_s1 + $0x260] ss:$16 sps:$4 sm:$0xff]   ;;  %v3795_v46 = vld [vmem:[%s5458_s1 + $0x268] ss:$16 sps:$4 sm:$0xff]  }
  0x2c   :  { %1446 = vmatprep.subr.bf16.mxu0 %v3732_v49  ;;  %1618 = vmatprep.subr.bf16.mxu1 %v3734_v50  ;;  %v3803_v49 = vld [vmem:[%s5458_s1 + $0x28c] ss:$16 sps:$4 sm:$0xff]   ;;  %v3798_v50 = vld [vmem:[%s5458_s1 + $0x280] ss:$16 sps:$4 sm:$0xff]  }
  0x2f   :  { %1447 = vmatpush1.bf16.msra.mxu0 %v3736_v51  ;;  %1619 = vmatpush1.bf16.msra.mxu1 %v3737_v52  ;;  %v3801_v51 = vld [vmem:[%s5458_s1 + $0x288] ss:$16 sps:$4 sm:$0xff]   ;;  %v3806_v52 = vld [vmem:[%s5458_s1 + $0x2a4] ss:$16 sps:$4 sm:$0xff]  }
  0x30   :  { %1448 = vmatprep.subr.bf16.mxu0 %v3738_v53  ;;  %1620 = vmatprep.subr.bf16.mxu1 %v3740_v55  ;;  %v3809_v53 = vld [vmem:[%s5458_s1 + $0x2ac] ss:$16 sps:$4 sm:$0xff]   ;;  %v3804_v55 = vld [vmem:[%s5458_s1 + $0x2a0] ss:$16 sps:$4 sm:$0xff]  }
  0x33   :  { %1449 = vmatpush1.bf16.msra.mxu0 %v3742_v59  ;;  %1621 = vmatpush1.bf16.msra.mxu1 %v3743_v60  ;;  %v3810_v59 = vld [vmem:[%s5458_s1 + $0x2c0] ss:$16 sps:$4 sm:$0xff]   ;;  %v3813_v60 = vld [vmem:[%s5458_s1 + $0x2c8] ss:$16 sps:$4 sm:$0xff]  }
  0x34   :  { %1450 = vmatprep.subr.bf16.mxu0 %v3744_v63  ;;  %1622 = vmatprep.subr.bf16.mxu1 %v3746_v2  ;;  %v3816_v63 = vld [vmem:[%s5458_s1 + $0x2e0] ss:$16 sps:$4 sm:$0xff]   ;;  %v3827_v2 = vld [vmem:[%s5458_s1 + $0x30c] ss:$16 sps:$4 sm:$0xff]  }
  0x37   :  { %1451 = vmatpush1.bf16.msra.mxu0 %v3748_v4  ;;  %1623 = vmatpush1.bf16.msra.mxu1 %v3749_v5  ;;  %v3825_v4 = vld [vmem:[%s5458_s1 + $0x308] ss:$16 sps:$4 sm:$0xff]   ;;  %v3830_v5 = vld [vmem:[%s5458_s1 + $0x324] ss:$16 sps:$4 sm:$0xff]  }
  0x38   :  { %1452 = vmatprep.subr.bf16.mxu0 %v3750_v7  ;;  %1624 = vmatprep.subr.bf16.mxu1 %v3752_v8  ;;  %v3828_v7 = vld [vmem:[%s5458_s1 + $0x320] ss:$16 sps:$4 sm:$0xff]   ;;  %v3831_v8 = vld [vmem:[%s5458_s1 + $0x328] ss:$16 sps:$4 sm:$0xff]  }
  0x3b   :  { %1453 = vmatpush1.bf16.msra.mxu0 %v3754_v15  ;;  %1625 = vmatpush1.bf16.msra.mxu1 %v3755_v16  ;;  %v3840_v15 = vld [vmem:[%s5458_s1 + $0x360] ss:$16 sps:$4 sm:$0xff]   ;;  %v3843_v16 = vld [vmem:[%s5458_s1 + $0x368] ss:$16 sps:$4 sm:$0xff]  }
  0x3c   :  { %1454 = vmatprep.subr.bf16.mxu0 %v3756_v17  ;;  %1626 = vmatprep.subr.bf16.mxu1 %v3758_v18  ;;  %v3848_v17 = vld [vmem:[%s5458_s1 + $0x384] ss:$16 sps:$4 sm:$0xff]   ;;  %v3851_v18 = vld [vmem:[%s5458_s1 + $0x38c] ss:$16 sps:$4 sm:$0xff]  }
  0x3f   :  { %1455 = vmatpush1.bf16.msra.mxu0 %v3760_v23  ;;  %1627 = vmatpush1.bf16.msra.mxu1 %v3761_v24  ;;  %v3846_v23 = vld [vmem:[%s5458_s1 + $0x380] ss:$16 sps:$4 sm:$0xff]   ;;  %v3849_v24 = vld [vmem:[%s5458_s1 + $0x388] ss:$16 sps:$4 sm:$0xff]  }
  0x40   :  { %1467 = vmatprep.subr.bf16.mxu0 %v3776_v27  ;;  %1639 = vmatprep.subr.bf16.mxu1 %v3779_v28  ;;  %v3852_v27 = vld [vmem:[%s5458_s1 + $0x3a0] ss:$16 sps:$4 sm:$0xff]   ;;  %v3855_v28 = vld [vmem:[%s5458_s1 + $0x3a8] ss:$16 sps:$4 sm:$0xff]  }
  0x42   :  { %1457 = vmatmul.mubr.bf16.vlgmr.msra.gmra.mrb[0].mxu0 %v215_v33  ;;  %1629 = vmatmul.mubr.bf16.vlgmr.msra.gmra.mrb[0].mxu1 %v215_v33  ;;  %v3866_v33 = vld [vmem:[%s5458_s1 + $0x3e4] ss:$16 sps:$4 sm:$0xff]  }
  0x43   :  { %1468 = vmatpush1.bf16.msra.mxu0 %v3774_v31  ;;  %1640 = vmatpush1.bf16.msra.mxu1 %v3777_v32  ;;  %v3858_v31 = vld [vmem:[%s5458_s1 + $0x3c0] ss:$16 sps:$4 sm:$0xff]   ;;  %v3861_v32 = vld [vmem:[%s5458_s1 + $0x3c8] ss:$16 sps:$4 sm:$0xff]  }
  0x44   :  { %1469 = vmatprep.subr.bf16.mxu0 %v3782_v34  ;;  %1641 = vmatprep.subr.bf16.mxu1 %v3785_v35  ;;  %v3869_v34 = vld [vmem:[%s5458_s1 + $0x3ec] ss:$16 sps:$4 sm:$0xff]   ;;  %v3864_v35 = vld [vmem:[%s5458_s1 + $0x3e0] ss:$16 sps:$4 sm:$0xff]  }
  0x45   :  { %1499 = vmatprep.mubr.bf16.mxu0 %v218_v36  ;;  %1671 = vmatprep.mubr.bf16.mxu1 %v218_v36  ;;  %v3867_v36 = vld [vmem:[%s5458_s1 + $0x3e8] ss:$16 sps:$4 sm:$0xff]  }
  0x47   :  { %1470 = vmatpush1.bf16.msra.mxu0 %v3780_v37  ;;  %1642 = vmatpush1.bf16.msra.mxu1 %v3783_v38  ;;  %v93_v37 = vcombine.low %v4471_v19, %v4474_v20  ;;  %v164_v38 = vcombine.low %v4477_v21, %v4480_v22  ;;  %v3873_v19 = vld [vmem:[%s5458_s1 + $0x408] ss:$16 sps:$4 sm:$0xff]   ;;  %v3878_v21 = vld [vmem:[%s5458_s1 + $0x424] ss:$16 sps:$4 sm:$0xff]   ;;  %v3881_v22 = vld [vmem:[%s5458_s1 + $0x42c] ss:$16 sps:$4 sm:$0xff]  }
  0x48   :  { %1471 = vmatprep.subr.bf16.mxu0 %v3788_v39  ;;  %1643 = vmatprep.subr.bf16.mxu1 %v3791_v40  ;;  %v3872_v39 = vld [vmem:[%s5458_s1 + $0x404] ss:$16 sps:$4 sm:$0xff]   ;;  %v3875_v40 = vld [vmem:[%s5458_s1 + $0x40c] ss:$16 sps:$4 sm:$0xff]  }
  0x49   :  { %v217_v20 = vpack.c.bf16 %v164_v38, %v93_v37  ;;  %v3944_v37 = vld [vmem:[%s5458_s1 + $0x584] ss:$16 sps:$4 sm:$0xff]   ;;  %v3947_v38 = vld [vmem:[%s5458_s1 + $0x58c] ss:$16 sps:$4 sm:$0xff]  }
  0x4b   :  { %1472 = vmatpush1.bf16.msra.mxu0 %v3786_v41  ;;  %1644 = vmatpush1.bf16.msra.mxu1 %v3789_v42  ;;  %v3870_v41 = vld [vmem:[%s5458_s1 + $0x400] ss:$16 sps:$4 sm:$0xff]  }
  0x4c   :  { %1473 = vmatprep.subr.bf16.mxu0 %v3794_v43  ;;  %1645 = vmatprep.subr.bf16.mxu1 %v3797_v44  ;;  %v3876_v42 = vld [vmem:[%s5458_s1 + $0x420] ss:$16 sps:$4 sm:$0xff]   ;;  %v3879_v43 = vld [vmem:[%s5458_s1 + $0x428] ss:$16 sps:$4 sm:$0xff]   ;;  %v3884_v44 = vld [vmem:[%s5458_s1 + $0x444] ss:$16 sps:$4 sm:$0xff]  }
  0x4f   :  { %1474 = vmatpush1.bf16.msra.mxu0 %v3792_v45  ;;  %1646 = vmatpush1.bf16.msra.mxu1 %v3795_v46  ;;  %v3887_v45 = vld [vmem:[%s5458_s1 + $0x44c] ss:$16 sps:$4 sm:$0xff]   ;;  %v3882_v46 = vld [vmem:[%s5458_s1 + $0x440] ss:$16 sps:$4 sm:$0xff]  }
  0x50   :  { %1475 = vmatprep.subr.bf16.mxu0 %v3800_v47  ;;  %1647 = vmatprep.subr.bf16.mxu1 %v3803_v49  ;;  %v3885_v47 = vld [vmem:[%s5458_s1 + $0x448] ss:$16 sps:$4 sm:$0xff]   ;;  %v3890_v49 = vld [vmem:[%s5458_s1 + $0x464] ss:$16 sps:$4 sm:$0xff]  }
  0x53   :  { %1476 = vmatpush1.bf16.msra.mxu0 %v3798_v50  ;;  %1648 = vmatpush1.bf16.msra.mxu1 %v3801_v51  ;;  %v3966_v50 = vld [vmem:[%s5457_s0 + $0x8] ss:$14 sps:$4 sm:$0xff]   ;;  %v3893_v51 = vld [vmem:[%s5458_s1 + $0x46c] ss:$16 sps:$4 sm:$0xff]  }
  0x54   :  { %1477 = vmatprep.subr.bf16.mxu0 %v3806_v52  ;;  %1649 = vmatprep.subr.bf16.mxu1 %v3809_v53  ;;  %v3969_v52 = vld [vmem:[%s5457_s0 + $0x24] ss:$14 sps:$4 sm:$0xff]   ;;  %v4737_v53 = vrot.slane %v3966_v50, %v4401_v54 }
  0x57   :  { %1478 = vmatpush1.bf16.msra.mxu0 %v3804_v55  ;;  %1650 = vmatpush1.bf16.msra.mxu1 %v3807_v56  ;;  %v3972_v55 = vld [vmem:[%s5457_s0 + $0x40] ss:$14 sps:$4 sm:$0xff]   ;;  %v4743_v56 = vrot.slane %v3969_v52, %v4401_v54  ;;  %v3980_v52 = vld [vmem:[%s5458_s1 + $0x604] ss:$16 sps:$4 sm:$0xff]  }
  0x58   :  { %1479 = vmatprep.subr.bf16.mxu0 %v3812_v57  ;;  %1651 = vmatprep.subr.bf16.mxu1 %v3815_v58  ;;  %v3975_v57 = vld [vmem:[%s5457_s0 + $0x5c] ss:$14 sps:$4 sm:$0xff]   ;;  %v3888_v58 = vld [vmem:[%s5458_s1 + $0x460] ss:$16 sps:$4 sm:$0xff]  }
  0x59   :  { %v127_v50 = vcombine.low %v4737_v53, %v4743_v56 }
  0x5b   :  { %1480 = vmatpush1.bf16.msra.mxu0 %v3810_v59  ;;  %1652 = vmatpush1.bf16.msra.mxu1 %v3813_v60  ;;  %v3891_v59 = vld [vmem:[%s5458_s1 + $0x468] ss:$16 sps:$4 sm:$0xff]   ;;  %v3896_v60 = vld [vmem:[%s5458_s1 + $0x484] ss:$16 sps:$4 sm:$0xff]  }
  0x5c   :  { %1481 = vmatprep.subr.bf16.mxu0 %v3818_v61  ;;  %1653 = vmatprep.subr.bf16.mxu1 %v3821_v62  ;;  %v4758_v61 = vrot.slane %v3972_v55, %v4401_v54  ;;  %v3899_v62 = vld [vmem:[%s5458_s1 + $0x48c] ss:$16 sps:$4 sm:$0xff]  }
  0x5d   :  { %v3983_v55 = vld [vmem:[%s5458_s1 + $0x60c] ss:$16 sps:$4 sm:$0xff]  }
  0x5f   :  { %1482 = vmatpush1.bf16.msra.mxu0 %v3816_v63  ;;  %1654 = vmatpush1.bf16.msra.mxu1 %v3819_v0  ;;  %v128_v63 = vcombine.high %v4737_v53, %v4743_v56  ;;  %v4766_v0 = vrot.slane %v3975_v57, %v4401_v54  ;;  %v3968_v57 = vld [vmem:[%s5457_s0 + $0xc] ss:$14 sps:$4 sm:$0x33]   ;;  %v3971_v53 = vld [vmem:[%s5457_s0 + $0x28] ss:$14 sps:$4 sm:$0x33]  }
  0x60   :  { %1483 = vmatprep.subr.bf16.mxu0 %v3824_v1  ;;  %1655 = vmatprep.subr.bf16.mxu1 %v3827_v2  ;;  %v3894_v1 = vld [vmem:[%s5458_s1 + $0x480] ss:$16 sps:$4 sm:$0xff]   ;;  %v3897_v2 = vld [vmem:[%s5458_s1 + $0x488] ss:$16 sps:$4 sm:$0xff]  }
  0x61   :  { %v3974_v56 = vld [vmem:[%s5457_s0 + $0x44] ss:$14 sps:$4 sm:$0x33]  }
  0x63   :  { %1484 = vmatpush1.bf16.msra.mxu0 %v3822_v3  ;;  %1656 = vmatpush1.bf16.msra.mxu1 %v3825_v4  ;;  %v199_v3 = vcombine.high %v4758_v61, %v4766_v0  ;;  %v3902_v4 = vld [vmem:[%s5458_s1 + $0x4a4] ss:$16 sps:$4 sm:$0xff]  }
  0x64   :  { %1485 = vmatprep.subr.bf16.mxu0 %v3830_v5  ;;  %1657 = vmatprep.subr.bf16.mxu1 %v3833_v6  ;;  %v3905_v5 = vld [vmem:[%s5458_s1 + $0x4ac] ss:$16 sps:$4 sm:$0xff]  }
  0x65   :  { %v220_v6 = vpack.c.bf16 %v199_v3, %v128_v63  ;;  %v3989_v63 = vld [vmem:[%s5460_s3 + $0xc] ss:$16 sps:$4 sm:$0xff]  }
  0x67   :  { %1486 = vmatpush1.bf16.msra.mxu0 %v3828_v7  ;;  %1658 = vmatpush1.bf16.msra.mxu1 %v3831_v8  ;;  %v3900_v7 = vld [vmem:[%s5458_s1 + $0x4a0] ss:$16 sps:$4 sm:$0xff]   ;;  %v3903_v8 = vld [vmem:[%s5458_s1 + $0x4a8] ss:$16 sps:$4 sm:$0xff]  }
  0x68   :  { %1487 = vmatprep.subr.bf16.mxu0 %v3836_v9  ;;  %1659 = vmatprep.subr.bf16.mxu1 %v3839_v10  ;;  %v3908_v9 = vld [vmem:[%s5458_s1 + $0x4c4] ss:$16 sps:$4 sm:$0xff]   ;;  %v3911_v10 = vld [vmem:[%s5458_s1 + $0x4cc] ss:$16 sps:$4 sm:$0xff]  }
  0x6b   :  { %1488 = vmatpush1.bf16.msra.mxu0 %v3834_v11  ;;  %1660 = vmatpush1.bf16.msra.mxu1 %v3837_v12  ;;  %v3906_v11 = vld [vmem:[%s5458_s1 + $0x4c0] ss:$16 sps:$4 sm:$0xff]   ;;  %v3909_v12 = vld [vmem:[%s5458_s1 + $0x4c8] ss:$16 sps:$4 sm:$0xff]  }
  0x6c   :  { %1489 = vmatprep.subr.bf16.mxu0 %v3842_v13  ;;  %1661 = vmatprep.subr.bf16.mxu1 %v3845_v14  ;;  %v3914_v13 = vld [vmem:[%s5458_s1 + $0x4e4] ss:$16 sps:$4 sm:$0xff]   ;;  %v3917_v14 = vld [vmem:[%s5458_s1 + $0x4ec] ss:$16 sps:$4 sm:$0xff]  }
  0x6f   :  { %1490 = vmatpush1.bf16.msra.mxu0 %v3840_v15  ;;  %1662 = vmatpush1.bf16.msra.mxu1 %v3843_v16  ;;  %v3912_v15 = vld [vmem:[%s5458_s1 + $0x4e0] ss:$16 sps:$4 sm:$0xff]   ;;  %v3915_v16 = vld [vmem:[%s5458_s1 + $0x4e8] ss:$16 sps:$4 sm:$0xff]  }
  0x70   :  { %1491 = vmatprep.subr.bf16.mxu0 %v3848_v17  ;;  %1663 = vmatprep.subr.bf16.mxu1 %v3851_v18  ;;  %v3920_v17 = vld [vmem:[%s5458_s1 + $0x504] ss:$16 sps:$4 sm:$0xff]   ;;  %v3923_v18 = vld [vmem:[%s5458_s1 + $0x50c] ss:$16 sps:$4 sm:$0xff]  }
  0x73   :  { %1492 = vmatpush1.bf16.msra.mxu0 %v3846_v23  ;;  %1664 = vmatpush1.bf16.msra.mxu1 %v3849_v24  ;;  %v3918_v23 = vld [vmem:[%s5458_s1 + $0x500] ss:$16 sps:$4 sm:$0xff]   ;;  %v3921_v24 = vld [vmem:[%s5458_s1 + $0x508] ss:$16 sps:$4 sm:$0xff]  }
  0x74   :  { %1493 = vmatprep.subr.bf16.mxu0 %v3854_v25  ;;  %1665 = vmatprep.subr.bf16.mxu1 %v3857_v26  ;;  %v3926_v25 = vld [vmem:[%s5458_s1 + $0x524] ss:$16 sps:$4 sm:$0xff]   ;;  %v3929_v26 = vld [vmem:[%s5458_s1 + $0x52c] ss:$16 sps:$4 sm:$0xff]  }
  0x77   :  { %1494 = vmatpush1.bf16.msra.mxu0 %v3852_v27  ;;  %1666 = vmatpush1.bf16.msra.mxu1 %v3855_v28  ;;  %v3924_v27 = vld [vmem:[%s5458_s1 + $0x520] ss:$16 sps:$4 sm:$0xff]   ;;  %v3927_v28 = vld [vmem:[%s5458_s1 + $0x528] ss:$16 sps:$4 sm:$0xff]  }
  0x78   :  { %1495 = vmatprep.subr.bf16.mxu0 %v3860_v29  ;;  %1667 = vmatprep.subr.bf16.mxu1 %v3863_v30  ;;  %v3932_v29 = vld [vmem:[%s5458_s1 + $0x544] ss:$16 sps:$4 sm:$0xff]   ;;  %v3935_v30 = vld [vmem:[%s5458_s1 + $0x54c] ss:$16 sps:$4 sm:$0xff]  }
  0x7b   :  { %1496 = vmatpush1.bf16.msra.mxu0 %v3858_v31  ;;  %1668 = vmatpush1.bf16.msra.mxu1 %v3861_v32  ;;  %v3930_v31 = vld [vmem:[%s5458_s1 + $0x540] ss:$16 sps:$4 sm:$0xff]   ;;  %v3933_v32 = vld [vmem:[%s5458_s1 + $0x548] ss:$16 sps:$4 sm:$0xff]  }
  0x7c   :  { %1497 = vmatprep.subr.bf16.mxu0 %v3866_v33  ;;  %1669 = vmatprep.subr.bf16.mxu1 %v3869_v34  ;;  %v3938_v33 = vld [vmem:[%s5458_s1 + $0x564] ss:$16 sps:$4 sm:$0xff]   ;;  %v3941_v34 = vld [vmem:[%s5458_s1 + $0x56c] ss:$16 sps:$4 sm:$0xff]  }
  0x7f   :  { %1498 = vmatpush1.bf16.msra.mxu0 %v3864_v35  ;;  %1670 = vmatpush1.bf16.msra.mxu1 %v3867_v36  ;;  %v3936_v35 = vld [vmem:[%s5458_s1 + $0x560] ss:$16 sps:$4 sm:$0xff]   ;;  %v3939_v36 = vld [vmem:[%s5458_s1 + $0x568] ss:$16 sps:$4 sm:$0xff]  }
  0x80   :  { %1510 = vmatprep.subr.bf16.mxu0 %v3872_v39  ;;  %1682 = vmatprep.subr.bf16.mxu1 %v3875_v40  ;;  %v3942_v39 = vld [vmem:[%s5458_s1 + $0x580] ss:$16 sps:$4 sm:$0xff]   ;;  %v3945_v40 = vld [vmem:[%s5458_s1 + $0x588] ss:$16 sps:$4 sm:$0xff]  }
  0x82   :  { %1500 = vmatmul.mubr.bf16.vlgmr.msra.gmra.mrb[0].mxu0 %v217_v20  ;;  %1672 = vmatmul.mubr.bf16.vlgmr.msra.gmra.mrb[0].mxu1 %v217_v20  ;;  %v3948_v20 = vld [vmem:[%s5458_s1 + $0x5a0] ss:$16 sps:$4 sm:$0xff]  }
  0x83   :  { %1511 = vmatpush1.bf16.msra.mxu0 %v3870_v41  ;;  %1683 = vmatpush1.bf16.msra.mxu1 %v3873_v19  ;;  %v3950_v41 = vld [vmem:[%s5458_s1 + $0x5a4] ss:$16 sps:$4 sm:$0xff]   ;;  %v3953_v19 = vld [vmem:[%s5458_s1 + $0x5ac] ss:$16 sps:$4 sm:$0xff]  }
  0x84   :  { %1512 = vmatprep.subr.bf16.mxu0 %v3878_v21  ;;  %1684 = vmatprep.subr.bf16.mxu1 %v3881_v22  ;;  %v3951_v21 = vld [vmem:[%s5458_s1 + $0x5a8] ss:$16 sps:$4 sm:$0xff]   ;;  %v3956_v22 = vld [vmem:[%s5458_s1 + $0x5c4] ss:$16 sps:$4 sm:$0xff]  }
  0x85   :  { %1542 = vmatprep.mubr.bf16.mxu0 %v220_v6  ;;  %1714 = vmatprep.mubr.bf16.mxu1 %v220_v6 }
  0x87   :  { %1513 = vmatpush1.bf16.msra.mxu0 %v3876_v42  ;;  %1685 = vmatpush1.bf16.msra.mxu1 %v3879_v43  ;;  %v3959_v42 = vld [vmem:[%s5458_s1 + $0x5cc] ss:$16 sps:$4 sm:$0xff]   ;;  %v3954_v43 = vld [vmem:[%s5458_s1 + $0x5c0] ss:$16 sps:$4 sm:$0xff]  }
  0x88   :  { %1514 = vmatprep.subr.bf16.mxu0 %v3884_v44  ;;  %1686 = vmatprep.subr.bf16.mxu1 %v3887_v45  ;;  %v3957_v44 = vld [vmem:[%s5458_s1 + $0x5c8] ss:$16 sps:$4 sm:$0xff]   ;;  %v3962_v45 = vld [vmem:[%s5458_s1 + $0x5e4] ss:$16 sps:$4 sm:$0xff]  }
  0x8b   :  { %1515 = vmatpush1.bf16.msra.mxu0 %v3882_v46  ;;  %1687 = vmatpush1.bf16.msra.mxu1 %v3885_v47  ;;  %v3965_v46 = vld [vmem:[%s5458_s1 + $0x5ec] ss:$16 sps:$4 sm:$0xff]   ;;  %v3960_v47 = vld [vmem:[%s5458_s1 + $0x5e0] ss:$16 sps:$4 sm:$0xff]  }
  0x8c   :  { %1516 = vmatprep.subr.bf16.mxu0 %v3890_v49  ;;  %1688 = vmatprep.subr.bf16.mxu1 %v3893_v51  ;;  %v3963_v49 = vld [vmem:[%s5458_s1 + $0x5e8] ss:$16 sps:$4 sm:$0xff]   ;;  %v198_v51 = vcombine.low %v4758_v61, %v4766_v0  ;;  %v112_v0 = vrot.slane %v3968_v57, %v4401_v54  ;;  %v4058_v57 = vld [vmem:[%s5460_s3 + $0x184] ss:$16 sps:$4 sm:$0xff]  }
  0x8e   :  { %v219_v61 = vpack.c.bf16 %v198_v51, %v127_v50  ;;  %v4052_v50 = vld [vmem:[%s5460_s3 + $0x164] ss:$16 sps:$4 sm:$0xff]   ;;  %v4055_v51 = vld [vmem:[%s5460_s3 + $0x16c] ss:$16 sps:$4 sm:$0xff]  }
  0x8f   :  { %1517 = vmatpush1.bf16.msra.mxu0 %v3888_v58  ;;  %1689 = vmatpush1.bf16.msra.mxu1 %v3891_v59  ;;  %v3977_v58 = vld [vmem:[%s5457_s0 + $0x60] ss:$14 sps:$4 sm:$0x33]  }
  0x90   :  { %1518 = vmatprep.subr.bf16.mxu0 %v3896_v60  ;;  %1690 = vmatprep.subr.bf16.mxu1 %v3899_v62  ;;  %v3978_v59 = vld [vmem:[%s5458_s1 + $0x600] ss:$16 sps:$4 sm:$0xff]   ;;  %v3981_v60 = vld [vmem:[%s5458_s1 + $0x608] ss:$16 sps:$4 sm:$0xff]   ;;  %v3986_v62 = vld [vmem:[%s5460_s3 + $0x4] ss:$16 sps:$4 sm:$0xff]   ;;  %v197_v3 = vrot.slane %v3977_v58, %v4401_v54 }
  0x91   :  { %v4059_v58 = vld [vmem:[%s5460_s3 + $0x188] ss:$16 sps:$4 sm:$0xff]  }
  0x93   :  { %1519 = vmatpush1.bf16.msra.mxu0 %v3894_v1  ;;  %1691 = vmatpush1.bf16.msra.mxu1 %v3897_v2  ;;  %v126_v1 = vrot.slane %v3971_v53, %v4401_v54  ;;  %v183_v2 = vrot.slane %v3974_v56, %v4401_v54  ;;  %v3987_v54 = vld [vmem:[%s5460_s3 + $0x8] ss:$16 sps:$4 sm:$0xff]   ;;  %v4061_v53 = vld [vmem:[%s5460_s3 + $0x18c] ss:$16 sps:$4 sm:$0xff]   ;;  %v4056_v56 = vld [vmem:[%s5460_s3 + $0x180] ss:$16 sps:$4 sm:$0xff]  }
  0x94   :  { %1520 = vmatprep.subr.bf16.mxu0 %v3902_v4  ;;  %1692 = vmatprep.subr.bf16.mxu1 %v3905_v5  ;;  %v4209_v4 = vmov 0  }
  0x95   :  { %v129_v5 = vcombine.low %v112_v0, %v126_v1  ;;  %v200_v6 = vcombine.low %v183_v2, %v197_v3  ;;  %v4073_v0 = vld [vmem:[%s5460_s3 + $0x1cc] ss:$16 sps:$4 sm:$0xff]   ;;  %v4068_v1 = vld [vmem:[%s5460_s3 + $0x1c0] ss:$16 sps:$4 sm:$0xff]   ;;  %v4071_v2 = vld [vmem:[%s5460_s3 + $0x1c8] ss:$16 sps:$4 sm:$0xff]  }
  0x96   :  { %v4076_v3 = vld [vmem:[%s5460_s3 + $0x1e4] ss:$16 sps:$4 sm:$0xff]  }
  0x97   :  { %1521 = vmatpush1.bf16.msra.mxu0 %v3900_v7  ;;  %1693 = vmatpush1.bf16.msra.mxu1 %v3903_v8  ;;  %v3984_v7 = vld [vmem:[%s5460_s3] ss:$16 sps:$4 sm:$0xff]   ;;  %v221_v8 = vpack.c.bf16 %v200_v6, %v129_v5  ;;  %v4077_v6 = vld [vmem:[%s5460_s3 + $0x1e8] ss:$16 sps:$4 sm:$0xff]  }
  0x98   :  { %1522 = vmatprep.subr.bf16.mxu0 %v3908_v9  ;;  %1694 = vmatprep.subr.bf16.mxu1 %v3911_v10  ;;  %v3992_v9 = vld [vmem:[%s5460_s3 + $0x24] ss:$16 sps:$4 sm:$0xff]   ;;  %v3995_v10 = vld [vmem:[%s5460_s3 + $0x2c] ss:$16 sps:$4 sm:$0xff]   ;;  %v4074_v5 = vld [vmem:[%s5460_s3 + $0x1e0] ss:$16 sps:$4 sm:$0xff]  }
  0x9b   :  { %1523 = vmatpush1.bf16.msra.mxu0 %v3906_v11  ;;  %1695 = vmatpush1.bf16.msra.mxu1 %v3909_v12  ;;  %v3990_v11 = vld [vmem:[%s5460_s3 + $0x20] ss:$16 sps:$4 sm:$0xff]   ;;  %v3993_v12 = vld [vmem:[%s5460_s3 + $0x28] ss:$16 sps:$4 sm:$0xff]  }
  0x9c   :  { %1524 = vmatprep.subr.bf16.mxu0 %v3914_v13  ;;  %1696 = vmatprep.subr.bf16.mxu1 %v3917_v14  ;;  %v3998_v13 = vld [vmem:[%s5460_s3 + $0x44] ss:$16 sps:$4 sm:$0xff]   ;;  %v4001_v14 = vld [vmem:[%s5460_s3 + $0x4c] ss:$16 sps:$4 sm:$0xff]  }
  0x9f   :  { %1525 = vmatpush1.bf16.msra.mxu0 %v3912_v15  ;;  %1697 = vmatpush1.bf16.msra.mxu1 %v3915_v16  ;;  %v3996_v15 = vld [vmem:[%s5460_s3 + $0x40] ss:$16 sps:$4 sm:$0xff]   ;;  %v3999_v16 = vld [vmem:[%s5460_s3 + $0x48] ss:$16 sps:$4 sm:$0xff]  }
  0xa0   :  { %1526 = vmatprep.subr.bf16.mxu0 %v3920_v17  ;;  %1698 = vmatprep.subr.bf16.mxu1 %v3923_v18  ;;  %v4004_v17 = vld [vmem:[%s5460_s3 + $0x64] ss:$16 sps:$4 sm:$0xff]   ;;  %v4007_v18 = vld [vmem:[%s5460_s3 + $0x6c] ss:$16 sps:$4 sm:$0xff]  }
  0xa3   :  { %1527 = vmatpush1.bf16.msra.mxu0 %v3918_v23  ;;  %1699 = vmatpush1.bf16.msra.mxu1 %v3921_v24  ;;  %v4002_v23 = vld [vmem:[%s5460_s3 + $0x60] ss:$16 sps:$4 sm:$0xff]   ;;  %v4005_v24 = vld [vmem:[%s5460_s3 + $0x68] ss:$16 sps:$4 sm:$0xff]  }
  0xa4   :  { %1528 = vmatprep.subr.bf16.mxu0 %v3926_v25  ;;  %1700 = vmatprep.subr.bf16.mxu1 %v3929_v26  ;;  %v4010_v25 = vld [vmem:[%s5460_s3 + $0x84] ss:$16 sps:$4 sm:$0xff]   ;;  %v4013_v26 = vld [vmem:[%s5460_s3 + $0x8c] ss:$16 sps:$4 sm:$0xff]  }
  0xa7   :  { %1529 = vmatpush1.bf16.msra.mxu0 %v3924_v27  ;;  %1701 = vmatpush1.bf16.msra.mxu1 %v3927_v28  ;;  %v4008_v27 = vld [vmem:[%s5460_s3 + $0x80] ss:$16 sps:$4 sm:$0xff]   ;;  %v4011_v28 = vld [vmem:[%s5460_s3 + $0x88] ss:$16 sps:$4 sm:$0xff]  }
  0xa8   :  { %1530 = vmatprep.subr.bf16.mxu0 %v3932_v29  ;;  %1702 = vmatprep.subr.bf16.mxu1 %v3935_v30  ;;  %v4016_v29 = vld [vmem:[%s5460_s3 + $0xa4] ss:$16 sps:$4 sm:$0xff]   ;;  %v4019_v30 = vld [vmem:[%s5460_s3 + $0xac] ss:$16 sps:$4 sm:$0xff]  }
  0xab   :  { %1531 = vmatpush1.bf16.msra.mxu0 %v3930_v31  ;;  %1703 = vmatpush1.bf16.msra.mxu1 %v3933_v32  ;;  %v4014_v31 = vld [vmem:[%s5460_s3 + $0xa0] ss:$16 sps:$4 sm:$0xff]   ;;  %v4017_v32 = vld [vmem:[%s5460_s3 + $0xa8] ss:$16 sps:$4 sm:$0xff]  }
  0xac   :  { %1532 = vmatprep.subr.bf16.mxu0 %v3938_v33  ;;  %1704 = vmatprep.subr.bf16.mxu1 %v3941_v34  ;;  %v4022_v33 = vld [vmem:[%s5460_s3 + $0xc4] ss:$16 sps:$4 sm:$0xff]   ;;  %v4025_v34 = vld [vmem:[%s5460_s3 + $0xcc] ss:$16 sps:$4 sm:$0xff]  }
  0xaf   :  { %1533 = vmatpush1.bf16.msra.mxu0 %v3936_v35  ;;  %1705 = vmatpush1.bf16.msra.mxu1 %v3939_v36  ;;  %v4020_v35 = vld [vmem:[%s5460_s3 + $0xc0] ss:$16 sps:$4 sm:$0xff]   ;;  %v4023_v36 = vld [vmem:[%s5460_s3 + $0xc8] ss:$16 sps:$4 sm:$0xff]  }
  0xb0   :  { %1534 = vmatprep.subr.bf16.mxu0 %v3944_v37  ;;  %1706 = vmatprep.subr.bf16.mxu1 %v3947_v38  ;;  %v4028_v37 = vld [vmem:[%s5460_s3 + $0xe4] ss:$16 sps:$4 sm:$0xff]   ;;  %v4031_v38 = vld [vmem:[%s5460_s3 + $0xec] ss:$16 sps:$4 sm:$0xff]  }
  0xb3   :  { %1535 = vmatpush1.bf16.msra.mxu0 %v3942_v39  ;;  %1707 = vmatpush1.bf16.msra.mxu1 %v3945_v40  ;;  %v4026_v39 = vld [vmem:[%s5460_s3 + $0xe0] ss:$16 sps:$4 sm:$0xff]   ;;  %v4029_v40 = vld [vmem:[%s5460_s3 + $0xe8] ss:$16 sps:$4 sm:$0xff]  }
  0xb4   :  { %1536 = vmatprep.subr.bf16.mxu0 %v3950_v41  ;;  %1708 = vmatprep.subr.bf16.mxu1 %v3953_v19  ;;  %v4034_v41 = vld [vmem:[%s5460_s3 + $0x104] ss:$16 sps:$4 sm:$0xff]   ;;  %v4037_v19 = vld [vmem:[%s5460_s3 + $0x10c] ss:$16 sps:$4 sm:$0xff]  }
  0xb7   :  { %1537 = vmatpush1.bf16.msra.mxu0 %v3948_v20  ;;  %1709 = vmatpush1.bf16.msra.mxu1 %v3951_v21  ;;  %v4032_v20 = vld [vmem:[%s5460_s3 + $0x100] ss:$16 sps:$4 sm:$0xff]   ;;  %v4035_v21 = vld [vmem:[%s5460_s3 + $0x108] ss:$16 sps:$4 sm:$0xff]  }
  0xb8   :  { %1538 = vmatprep.subr.bf16.mxu0 %v3956_v22  ;;  %1710 = vmatprep.subr.bf16.mxu1 %v3959_v42  ;;  %v4040_v22 = vld [vmem:[%s5460_s3 + $0x124] ss:$16 sps:$4 sm:$0xff]   ;;  %v4043_v42 = vld [vmem:[%s5460_s3 + $0x12c] ss:$16 sps:$4 sm:$0xff]  }
  0xbb   :  { %1539 = vmatpush1.bf16.msra.mxu0 %v3954_v43  ;;  %1711 = vmatpush1.bf16.msra.mxu1 %v3957_v44  ;;  %v4038_v43 = vld [vmem:[%s5460_s3 + $0x120] ss:$16 sps:$4 sm:$0xff]   ;;  %v4041_v44 = vld [vmem:[%s5460_s3 + $0x128] ss:$16 sps:$4 sm:$0xff]  }
  0xbc   :  { %1540 = vmatprep.subr.bf16.mxu0 %v3962_v45  ;;  %1712 = vmatprep.subr.bf16.mxu1 %v3965_v46  ;;  %v4046_v45 = vld [vmem:[%s5460_s3 + $0x144] ss:$16 sps:$4 sm:$0xff]   ;;  %v4049_v46 = vld [vmem:[%s5460_s3 + $0x14c] ss:$16 sps:$4 sm:$0xff]  }
  0xbf   :  { %1541 = vmatpush1.bf16.msra.mxu0 %v3960_v47  ;;  %1713 = vmatpush1.bf16.msra.mxu1 %v3963_v49  ;;  %v4044_v47 = vld [vmem:[%s5460_s3 + $0x140] ss:$16 sps:$4 sm:$0xff]   ;;  %v4047_v49 = vld [vmem:[%s5460_s3 + $0x148] ss:$16 sps:$4 sm:$0xff]  }
  0xc0   :  { %1553 = vmatprep.subr.bf16.mxu0 %v3980_v52  ;;  %1725 = vmatprep.subr.bf16.mxu1 %v3983_v55  ;;  %v4050_v52 = vld [vmem:[%s5460_s3 + $0x160] ss:$16 sps:$4 sm:$0xff]   ;;  %v4053_v55 = vld [vmem:[%s5460_s3 + $0x168] ss:$16 sps:$4 sm:$0xff]  }
  0xc2   :  { %1543 = vmatmul.mubr.bf16.vlgmr.msra.gmra.mrb[0].mxu0 %v219_v61  ;;  %1715 = vmatmul.mubr.bf16.vlgmr.msra.gmra.mrb[0].mxu1 %v219_v61  ;;  %v4062_v61 = vld [vmem:[%s5460_s3 + $0x1a0] ss:$16 sps:$4 sm:$0xff]  }
  0xc3   :  { %1554 = vmatpush1.bf16.msra.mxu0 %v3978_v59  ;;  %1726 = vmatpush1.bf16.msra.mxu1 %v3981_v60  ;;  %v4064_v59 = vld [vmem:[%s5460_s3 + $0x1a4] ss:$16 sps:$4 sm:$0xff]   ;;  %v4067_v60 = vld [vmem:[%s5460_s3 + $0x1ac] ss:$16 sps:$4 sm:$0xff]  }
  0xc4   :  { %1585 = vmatprep.mubr.bf16.mxu0 %v4209_v4  ;;  %1757 = vmatprep.mubr.bf16.mxu1 %v4209_v4  ;;  %v4079_v4 = vld [vmem:[%s5460_s3 + $0x1ec] ss:$16 sps:$4 sm:$0xff]  }
  0xc5   :  { %2570 = vmatprep.subr.bf16.mxu0 %v3986_v62  ;;  %2656 = vmatprep.subr.bf16.mxu1 %v3989_v63  ;;  %v4065_v62 = vld [vmem:[%s5460_s3 + $0x1a8] ss:$16 sps:$4 sm:$0xff]   ;;  %v4070_v63 = vld [vmem:[%s5460_s3 + $0x1c4] ss:$16 sps:$4 sm:$0xff]  }
  0xce   :  { %3403 = vmatmul.mubr.msk.bf16.vlgmr.msra.gmra.mrb[0].mxu0 %vm1420_vm0, %v221_v8  ;;  %3404 = vmatmul.mubr.msk.bf16.vlgmr.msra.gmra.mrb[0].mxu1 %vm1420_vm0, %v221_v8  ;;  %v422_v8 = vsub.s32 0, %v4383_v48 }
  0xcf   :  { %2571 = vmatpush1.bf16.msra.mxu0 %v3984_v7  ;;  %2657 = vmatpush1.bf16.msra.mxu1 %v3987_v54  ;;  %v4082_v7 = vld [vmem:[%s5460_s3 + $0x204] ss:$16 sps:$4 sm:$0xff]   ;;  %v4085_v54 = vld [vmem:[%s5460_s3 + $0x20c] ss:$16 sps:$4 sm:$0xff]  }
  0xd0   :  { %2572 = vmatprep.subr.bf16.mxu0 %v3992_v9  ;;  %2658 = vmatprep.subr.bf16.mxu1 %v3995_v10  ;;  %v430_v9 = vsub.s32 2, %v4383_v48  ;;  %v418_v10 = vld [vmem:[%s5459_s2] sm:$0xf] }
  0xd3   :  { %2573 = vmatpush1.bf16.msra.mxu0 %v3990_v11  ;;  %2659 = vmatpush1.bf16.msra.mxu1 %v3993_v12  ;;  %v426_v11 = vsub.s32 1, %v4383_v48  ;;  %v434_v12 = vsub.s32 3, %v4383_v48 }
  0xd4   :  { %2574 = vmatprep.subr.bf16.mxu0 %v3998_v13  ;;  %2660 = vmatprep.subr.bf16.mxu1 %v4001_v14  ;;  %v423_v13 = vrot.slane %v418_v10, %v422_v8  ;;  %v431_v14 = vrot.slane %v418_v10, %v430_v9 }
  0xd7   :  { %2575 = vmatpush1.bf16.msra.mxu0 %v3996_v15  ;;  %2661 = vmatpush1.bf16.msra.mxu1 %v3999_v16  ;;  %v427_v15 = vrot.slane %v418_v10, %v426_v11  ;;  %v435_v16 = vrot.slane %v418_v10, %v434_v12  ;;  %v4124_v10 = vld [vmem:[%s5460_s3 + $0x2e4] ss:$16 sps:$4 sm:$0xff]  }
  0xd8   :  { %2576 = vmatprep.subr.bf16.mxu0 %v4004_v17  ;;  %2662 = vmatprep.subr.bf16.mxu1 %v4007_v18 }
  0xdb   :  { %2577 = vmatpush1.bf16.msra.mxu0 %v4002_v23  ;;  %2663 = vmatpush1.bf16.msra.mxu1 %v4005_v24 }
  0xdc   :  { %2578 = vmatprep.subr.bf16.mxu0 %v4010_v25  ;;  %2664 = vmatprep.subr.bf16.mxu1 %v4013_v26 }
  0xdf   :  { %2579 = vmatpush1.bf16.msra.mxu0 %v4008_v27  ;;  %2665 = vmatpush1.bf16.msra.mxu1 %v4011_v28 }
  0xe0   :  { %2580 = vmatprep.subr.bf16.mxu0 %v4016_v29  ;;  %2666 = vmatprep.subr.bf16.mxu1 %v4019_v30 }
  0xe3   :  { %2581 = vmatpush1.bf16.msra.mxu0 %v4014_v31  ;;  %2667 = vmatpush1.bf16.msra.mxu1 %v4017_v32 }
  0xe4   :  { %2582 = vmatprep.subr.bf16.mxu0 %v4022_v33  ;;  %2668 = vmatprep.subr.bf16.mxu1 %v4025_v34 }
  0xe7   :  { %2583 = vmatpush1.bf16.msra.mxu0 %v4020_v35  ;;  %2669 = vmatpush1.bf16.msra.mxu1 %v4023_v36 }
  0xe8   :  { %2584 = vmatprep.subr.bf16.mxu0 %v4028_v37  ;;  %2670 = vmatprep.subr.bf16.mxu1 %v4031_v38 }
  0xeb   :  { %2585 = vmatpush1.bf16.msra.mxu0 %v4026_v39  ;;  %2671 = vmatpush1.bf16.msra.mxu1 %v4029_v40 }
  0xec   :  { %2586 = vmatprep.subr.bf16.mxu0 %v4034_v41  ;;  %2672 = vmatprep.subr.bf16.mxu1 %v4037_v19 }
  0xef   :  { %2587 = vmatpush1.bf16.msra.mxu0 %v4032_v20  ;;  %2673 = vmatpush1.bf16.msra.mxu1 %v4035_v21 }
  0xf0   :  { %2588 = vmatprep.subr.bf16.mxu0 %v4040_v22  ;;  %2674 = vmatprep.subr.bf16.mxu1 %v4043_v42 }
  0xf3   :  { %2589 = vmatpush1.bf16.msra.mxu0 %v4038_v43  ;;  %2675 = vmatpush1.bf16.msra.mxu1 %v4041_v44 }
  0xf4   :  { %2590 = vmatprep.subr.bf16.mxu0 %v4046_v45  ;;  %2676 = vmatprep.subr.bf16.mxu1 %v4049_v46  ;;  %v4080_v45 = vld [vmem:[%s5460_s3 + $0x200] ss:$16 sps:$4 sm:$0xff]   ;;  %v4083_v46 = vld [vmem:[%s5460_s3 + $0x208] ss:$16 sps:$4 sm:$0xff]  }
  0xf7   :  { %2591 = vmatpush1.bf16.msra.mxu0 %v4044_v47  ;;  %2677 = vmatpush1.bf16.msra.mxu1 %v4047_v49  ;;  %v4088_v47 = vld [vmem:[%s5460_s3 + $0x224] ss:$16 sps:$4 sm:$0xff]   ;;  %v4091_v49 = vld [vmem:[%s5460_s3 + $0x22c] ss:$16 sps:$4 sm:$0xff]  }
  0xf8   :  { %2592 = vmatprep.subr.bf16.mxu0 %v4052_v50  ;;  %2678 = vmatprep.subr.bf16.mxu1 %v4055_v51  ;;  %v4086_v50 = vld [vmem:[%s5460_s3 + $0x220] ss:$16 sps:$4 sm:$0xff]   ;;  %v4089_v51 = vld [vmem:[%s5460_s3 + $0x228] ss:$16 sps:$4 sm:$0xff]  }
  0xfb   :  { %2593 = vmatpush1.bf16.msra.mxu0 %v4050_v52  ;;  %2679 = vmatpush1.bf16.msra.mxu1 %v4053_v55  ;;  %v4094_v52 = vld [vmem:[%s5460_s3 + $0x244] ss:$16 sps:$4 sm:$0xff]   ;;  %v4097_v55 = vld [vmem:[%s5460_s3 + $0x24c] ss:$16 sps:$4 sm:$0xff]  }
  0xfc   :  { %2594 = vmatprep.subr.bf16.mxu0 %v4058_v57  ;;  %2680 = vmatprep.subr.bf16.mxu1 %v4061_v53  ;;  %v4092_v57 = vld [vmem:[%s5460_s3 + $0x240] ss:$16 sps:$4 sm:$0xff]   ;;  %v4095_v53 = vld [vmem:[%s5460_s3 + $0x248] ss:$16 sps:$4 sm:$0xff]  }
  0xff   :  { %2595 = vmatpush1.bf16.msra.mxu0 %v4056_v56  ;;  %2681 = vmatpush1.bf16.msra.mxu1 %v4059_v58  ;;  %v4100_v56 = vld [vmem:[%s5460_s3 + $0x264] ss:$16 sps:$4 sm:$0xff]   ;;  %v4103_v58 = vld [vmem:[%s5460_s3 + $0x26c] ss:$16 sps:$4 sm:$0xff]  }
 0x100   :  { %2596 = vmatprep.subr.bf16.mxu0 %v4064_v59  ;;  %2682 = vmatprep.subr.bf16.mxu1 %v4067_v60  ;;  %v4098_v59 = vld [vmem:[%s5460_s3 + $0x260] ss:$16 sps:$4 sm:$0xff]   ;;  %v4101_v60 = vld [vmem:[%s5460_s3 + $0x268] ss:$16 sps:$4 sm:$0xff]  }
 0x103   :  { %2597 = vmatpush1.bf16.msra.mxu0 %v4062_v61  ;;  %2683 = vmatpush1.bf16.msra.mxu1 %v4065_v62  ;;  %v4106_v61 = vld [vmem:[%s5460_s3 + $0x284] ss:$16 sps:$4 sm:$0xff]   ;;  %v4109_v62 = vld [vmem:[%s5460_s3 + $0x28c] ss:$16 sps:$4 sm:$0xff]  }
 0x104   :  { %2598 = vmatprep.subr.bf16.mxu0 %v4070_v63  ;;  %2684 = vmatprep.subr.bf16.mxu1 %v4073_v0  ;;  %v4104_v63 = vld [vmem:[%s5460_s3 + $0x280] ss:$16 sps:$4 sm:$0xff]   ;;  %v4107_v0 = vld [vmem:[%s5460_s3 + $0x288] ss:$16 sps:$4 sm:$0xff]  }
 0x107   :  { %2599 = vmatpush1.bf16.msra.mxu0 %v4068_v1  ;;  %2685 = vmatpush1.bf16.msra.mxu1 %v4071_v2  ;;  %v4112_v1 = vld [vmem:[%s5460_s3 + $0x2a4] ss:$16 sps:$4 sm:$0xff]   ;;  %v4115_v2 = vld [vmem:[%s5460_s3 + $0x2ac] ss:$16 sps:$4 sm:$0xff]  }
 0x108   :  { %2600 = vmatprep.subr.bf16.mxu0 %v4076_v3  ;;  %2686 = vmatprep.subr.bf16.mxu1 %v4079_v4  ;;  %v4110_v3 = vld [vmem:[%s5460_s3 + $0x2a0] ss:$16 sps:$4 sm:$0xff]   ;;  %v4113_v4 = vld [vmem:[%s5460_s3 + $0x2a8] ss:$16 sps:$4 sm:$0xff]  }
 0x10b   :  { %2601 = vmatpush1.bf16.msra.mxu0 %v4074_v5  ;;  %2687 = vmatpush1.bf16.msra.mxu1 %v4077_v6  ;;  %v4118_v5 = vld [vmem:[%s5460_s3 + $0x2c4] ss:$16 sps:$4 sm:$0xff]   ;;  %v4121_v6 = vld [vmem:[%s5460_s3 + $0x2cc] ss:$16 sps:$4 sm:$0xff]  }
 0x10c   :  { %2613 = vmatprep.subr.bf16.mxu0 %v4082_v7  ;;  %2699 = vmatprep.subr.bf16.mxu1 %v4085_v54  ;;  %v4116_v7 = vld [vmem:[%s5460_s3 + $0x2c0] ss:$16 sps:$4 sm:$0xff]   ;;  %v4119_v54 = vld [vmem:[%s5460_s3 + $0x2c8] ss:$16 sps:$4 sm:$0xff]  }
 0x1a1   :  { %v1587_v17 = vpop.f32.mrb[0].mxu0  ;;  %v1759_v18 = vpop.f32.mrb[0].mxu1 }
 0x1a2   :  { %v3615_v23 = vadd.f32 %v1587_v17, %v423_v13  ;;  %v3619_v24 = vadd.f32 %v1759_v18, %v431_v14  ;;  %v1589_v25 = vpop.f32.mrb[1].mxu0  ;;  %v1761_v26 = vpop.f32.mrb[1].mxu1  ;;  %v4133_v17 = vld [vmem:[%s5460_s3 + $0x30c] ss:$16 sps:$4 sm:$0xff]   ;;  %v4128_v18 = vld [vmem:[%s5460_s3 + $0x300] ss:$16 sps:$4 sm:$0xff]  }
 0x1a3   :  { %v3616_v27 = vadd.f32 %v1589_v25, %v427_v15  ;;  %v3620_v28 = vadd.f32 %v1761_v26, %v435_v16  ;;  %v1591_v29 = vpop.f32.mrb[2].mxu0  ;;  %v1763_v30 = vpop.f32.mrb[2].mxu1  ;;  %v4139_v25 = vld [vmem:[%s5460_s3 + $0x32c] ss:$16 sps:$4 sm:$0xff]   ;;  %v4134_v26 = vld [vmem:[%s5460_s3 + $0x320] ss:$16 sps:$4 sm:$0xff]  }
 0x1a4   :  { %v3617_v31 = vadd.f32 %v1591_v29, %v423_v13  ;;  %v3621_v32 = vadd.f32 %v1763_v30, %v431_v14  ;;  %v1593_v33 = vpop.f32.mrb[3].mxu0  ;;  %v1765_v34 = vpop.f32.mrb[3].mxu1  ;;  %v1768_v37 = vmax.f32 %v3615_v23, 0.0  ;;  %v1770_v38 = vmax.f32 %v3619_v24, 0.0  ;;  %v4127_v13 = vld [vmem:[%s5460_s3 + $0x2ec] ss:$16 sps:$4 sm:$0xff]  }
 0x1a5   :  { %v3618_v35 = vadd.f32 %v1593_v33, %v427_v15  ;;  %v3622_v36 = vadd.f32 %v1765_v34, %v435_v16  ;;  %v1769_v41 = vmax.f32 %v3616_v27, 0.0  ;;  %v1771_v19 = vmax.f32 %v3620_v28, 0.0  ;;  %v4122_v14 = vld [vmem:[%s5460_s3 + $0x2e0] ss:$16 sps:$4 sm:$0xff]   ;;  %v4125_v15 = vld [vmem:[%s5460_s3 + $0x2e8] ss:$16 sps:$4 sm:$0xff]  }
 0x1a6   :  { %v1772_v39 = vmax.f32 %v3617_v31, 0.0  ;;  %v1774_v40 = vmax.f32 %v3621_v32, 0.0  ;;  %v4130_v16 = vld [vmem:[%s5460_s3 + $0x304] ss:$16 sps:$4 sm:$0xff]   ;;  %v4131_v23 = vld [vmem:[%s5460_s3 + $0x308] ss:$16 sps:$4 sm:$0xff]  }
 0x1a7   :  { %v1773_v20 = vmax.f32 %v3618_v35, 0.0  ;;  %v1775_v21 = vmax.f32 %v3622_v36, 0.0  ;;  %v4136_v24 = vld [vmem:[%s5460_s3 + $0x324] ss:$16 sps:$4 sm:$0xff]   ;;  %v4137_v27 = vld [vmem:[%s5460_s3 + $0x328] ss:$16 sps:$4 sm:$0xff]  }
 0x1a8   :  { %v1776_v22 = vpack.c.bf16 %v1772_v39, %v1768_v37  ;;  %v5153_v42 = vpack.c.bf16 %v1774_v40, %v1770_v38  ;;  %v4142_v28 = vld [vmem:[%s5460_s3 + $0x344] ss:$16 sps:$4 sm:$0xff]   ;;  %v4145_v29 = vld [vmem:[%s5460_s3 + $0x34c] ss:$16 sps:$4 sm:$0xff]   ;;  %v4140_v30 = vld [vmem:[%s5460_s3 + $0x340] ss:$16 sps:$4 sm:$0xff]  }
 0x1a9   :  { %v1777_v43 = vpack.c.bf16 %v1773_v20, %v1769_v41  ;;  %v1779_v44 = vpack.c.bf16 %v1775_v21, %v1771_v19  ;;  %v4143_v31 = vld [vmem:[%s5460_s3 + $0x348] ss:$16 sps:$4 sm:$0xff]   ;;  %v4148_v32 = vld [vmem:[%s5460_s3 + $0x364] ss:$16 sps:$4 sm:$0xff]   ;;  %v4151_v33 = vld [vmem:[%s5460_s3 + $0x36c] ss:$16 sps:$4 sm:$0xff]  }
 0x1aa   :  { %v4146_v34 = vld [vmem:[%s5460_s3 + $0x360] ss:$16 sps:$4 sm:$0xff]   ;;  %v4149_v35 = vld [vmem:[%s5460_s3 + $0x368] ss:$16 sps:$4 sm:$0xff]   ;;  %v4154_v36 = vld [vmem:[%s5460_s3 + $0x384] ss:$16 sps:$4 sm:$0xff]  }
 0x1ab   :  { %2602 = vmatprep.mubr.bf16.mxu0 %v1777_v43  ;;  %2688 = vmatprep.mubr.bf16.mxu1 %v1777_v43  ;;  %v4157_v37 = vld [vmem:[%s5460_s3 + $0x38c] ss:$16 sps:$4 sm:$0xff]   ;;  %v4152_v38 = vld [vmem:[%s5460_s3 + $0x380] ss:$16 sps:$4 sm:$0xff]   ;;  %v4155_v39 = vld [vmem:[%s5460_s3 + $0x388] ss:$16 sps:$4 sm:$0xff]  }
 0x1ac   :  { %2603 = vmatmul.mubr.bf16.vlgmr.msra.gmra.mrb[4].mxu0 %v1776_v22  ;;  %2689 = vmatmul.mubr.bf16.vlgmr.msra.gmra.mrb[4].mxu1 %v1776_v22  ;;  %v4160_v40 = vld [vmem:[%s5460_s3 + $0x3a4] ss:$16 sps:$4 sm:$0xff]   ;;  %v4163_v41 = vld [vmem:[%s5460_s3 + $0x3ac] ss:$16 sps:$4 sm:$0xff]   ;;  %v4158_v19 = vld [vmem:[%s5460_s3 + $0x3a0] ss:$16 sps:$4 sm:$0xff]  }
 0x1ad   :  { %2614 = vmatpush1.bf16.msra.mxu0 %v4080_v45  ;;  %2700 = vmatpush1.bf16.msra.mxu1 %v4083_v46  ;;  %v4161_v20 = vld [vmem:[%s5460_s3 + $0x3a8] ss:$16 sps:$4 sm:$0xff]   ;;  %v4166_v21 = vld [vmem:[%s5460_s3 + $0x3c4] ss:$16 sps:$4 sm:$0xff]   ;;  %v4169_v22 = vld [vmem:[%s5460_s3 + $0x3cc] ss:$16 sps:$4 sm:$0xff]  }
 0x1ae   :  { %2645 = vmatprep.mubr.bf16.mxu0 %v1779_v44  ;;  %2731 = vmatprep.mubr.bf16.mxu1 %v1779_v44  ;;  %v4164_v43 = vld [vmem:[%s5460_s3 + $0x3c0] ss:$16 sps:$4 sm:$0xff]   ;;  %v4167_v44 = vld [vmem:[%s5460_s3 + $0x3c8] ss:$16 sps:$4 sm:$0xff]   ;;  %v4172_v45 = vld [vmem:[%s5460_s3 + $0x3e4] ss:$16 sps:$4 sm:$0xff]  }
 0x1af   :  { %2615 = vmatprep.subr.bf16.mxu0 %v4088_v47  ;;  %2701 = vmatprep.subr.bf16.mxu1 %v4091_v49  ;;  %v4175_v46 = vld [vmem:[%s5460_s3 + $0x3ec] ss:$16 sps:$4 sm:$0xff]   ;;  %v4170_v47 = vld [vmem:[%s5460_s3 + $0x3e0] ss:$16 sps:$4 sm:$0xff]   ;;  %v4173_v49 = vld [vmem:[%s5460_s3 + $0x3e8] ss:$16 sps:$4 sm:$0xff]  }
 0x1b1   :  { %2616 = vmatpush1.bf16.msra.mxu0 %v4086_v50  ;;  %2702 = vmatpush1.bf16.msra.mxu1 %v4089_v51  ;;  %v4176_v50 = vld [vmem:[%s5462_s5 + $0x40] sm:$0xff]  }
 0x1b2   :  { %2617 = vmatprep.subr.bf16.mxu0 %v4094_v52  ;;  %2703 = vmatprep.subr.bf16.mxu1 %v4097_v55  ;;  %v4177_v51 = vld [vmem:[%s5462_s5 + $0xc0] sm:$0xff]  }
 0x1b3   :  { %v4178_v52 = vld [vmem:[%s5462_s5] sm:$0xff]  }
 0x1b4   :  { %v4179_v55 = vld [vmem:[%s5462_s5 + $0x80] sm:$0xff]  }
 0x1b5   :  { %2618 = vmatpush1.bf16.msra.mxu0 %v4092_v57  ;;  %2704 = vmatpush1.bf16.msra.mxu1 %v4095_v53  ;;  %v4180_v57 = vld [vmem:[%s5462_s5 + $0x48] sm:$0xff]  }
 0x1b6   :  { %2619 = vmatprep.subr.bf16.mxu0 %v4100_v56  ;;  %2705 = vmatprep.subr.bf16.mxu1 %v4103_v58  ;;  %v4181_v53 = vld [vmem:[%s5462_s5 + $0xc8] sm:$0xff]  }
 0x1b7   :  { %v4182_v56 = vld [vmem:[%s5462_s5 + $0x8] sm:$0xff]  }
 0x1b8   :  { %v4183_v58 = vld [vmem:[%s5462_s5 + $0x88] sm:$0xff]  }
 0x1b9   :  { %2620 = vmatpush1.bf16.msra.mxu0 %v4098_v59  ;;  %2706 = vmatpush1.bf16.msra.mxu1 %v4101_v60  ;;  %v4184_v59 = vld [vmem:[%s5462_s5 + $0x50] sm:$0xff]  }
 0x1ba   :  { %2621 = vmatprep.subr.bf16.mxu0 %v4106_v61  ;;  %2707 = vmatprep.subr.bf16.mxu1 %v4109_v62  ;;  %v4186_v60 = vld [vmem:[%s5462_s5 + $0x10] sm:$0xff]   ;;  %v4188_v62 = vld [vmem:[%s5462_s5 + $0x58] sm:$0xff]  }
 0x1bb   :  { %v4187_v61 = vld [vmem:[%s5462_s5 + $0x90] sm:$0xff]  }
 0x1bd   :  { %2622 = vmatpush1.bf16.msra.mxu0 %v4104_v63  ;;  %2708 = vmatpush1.bf16.msra.mxu1 %v4107_v0  ;;  %v4189_v63 = vld [vmem:[%s5462_s5 + $0xd8] sm:$0xff]  }
 0x1be   :  { %2623 = vmatprep.subr.bf16.mxu0 %v4112_v1  ;;  %2709 = vmatprep.subr.bf16.mxu1 %v4115_v2  ;;  %v4190_v0 = vld [vmem:[%s5462_s5 + $0x18] sm:$0xff]   ;;  %v4192_v2 = vld [vmem:[%s5462_s5 + $0x60] sm:$0xff]  }
 0x1bf   :  { %v4191_v1 = vld [vmem:[%s5462_s5 + $0x98] sm:$0xff]  }
 0x1c1   :  { %2624 = vmatpush1.bf16.msra.mxu0 %v4110_v3  ;;  %2710 = vmatpush1.bf16.msra.mxu1 %v4113_v4  ;;  %v4193_v3 = vld [vmem:[%s5462_s5 + $0xe0] sm:$0xff]  }
 0x1c2   :  { %2625 = vmatprep.subr.bf16.mxu0 %v4118_v5  ;;  %2711 = vmatprep.subr.bf16.mxu1 %v4121_v6  ;;  %v4194_v4 = vld [vmem:[%s5462_s5 + $0x20] sm:$0xff]   ;;  %v4196_v6 = vld [vmem:[%s5462_s5 + $0x68] sm:$0xff]  }
 0x1c3   :  { %v4195_v5 = vld [vmem:[%s5462_s5 + $0xa0] sm:$0xff]  }
 0x1c5   :  { %2626 = vmatpush1.bf16.msra.mxu0 %v4116_v7  ;;  %2712 = vmatpush1.bf16.msra.mxu1 %v4119_v54  ;;  %v4197_v7 = vld [vmem:[%s5462_s5 + $0xe8] sm:$0xff]  }
 0x1c6   :  { %2627 = vmatprep.subr.bf16.mxu0 %v4124_v10  ;;  %2713 = vmatprep.subr.bf16.mxu1 %v4127_v13  ;;  %v4198_v54 = vld [vmem:[%s5462_s5 + $0x28] sm:$0xff]   ;;  %v4200_v13 = vld [vmem:[%s5462_s5 + $0x70] sm:$0xff]  }
 0x1c7   :  { %v4199_v10 = vld [vmem:[%s5462_s5 + $0xa8] sm:$0xff]  }
 0x1c9   :  { %2628 = vmatpush1.bf16.msra.mxu0 %v4122_v14  ;;  %2714 = vmatpush1.bf16.msra.mxu1 %v4125_v15  ;;  %v4201_v14 = vld [vmem:[%s5462_s5 + $0xf0] sm:$0xff]  }
 0x1ca   :  { %2629 = vmatprep.subr.bf16.mxu0 %v4130_v16  ;;  %2715 = vmatprep.subr.bf16.mxu1 %v4133_v17  ;;  %v4202_v15 = vld [vmem:[%s5462_s5 + $0x30] sm:$0xff]   ;;  %v4204_v17 = vld [vmem:[%s5462_s5 + $0x78] sm:$0xff]  }
 0x1cb   :  { %v4203_v16 = vld [vmem:[%s5462_s5 + $0xb0] sm:$0xff]  }
 0x1cd   :  { %2630 = vmatpush1.bf16.msra.mxu0 %v4128_v18  ;;  %2716 = vmatpush1.bf16.msra.mxu1 %v4131_v23  ;;  %v4205_v18 = vld [vmem:[%s5462_s5 + $0xf8] sm:$0xff]  }
 0x1ce   :  { %2631 = vmatprep.subr.bf16.mxu0 %v4136_v24  ;;  %2717 = vmatprep.subr.bf16.mxu1 %v4139_v25  ;;  %v4206_v23 = vld [vmem:[%s5462_s5 + $0x38] sm:$0xff]   ;;  %v1908_v25 = vld [vmem:[%s5461_s4] sm:$0xf] }
 0x1cf   :  { %v4207_v24 = vld [vmem:[%s5462_s5 + $0xb8] sm:$0xff]  }
 0x1d1   :  { %2632 = vmatpush1.bf16.msra.mxu0 %v4134_v26  ;;  %2718 = vmatpush1.bf16.msra.mxu1 %v4137_v27  ;;  %v1913_v26 = vrot.slane %v1908_v25, %v422_v8  ;;  %v1921_v27 = vrot.slane %v1908_v25, %v430_v9 }
 0x1d2   :  { %2633 = vmatprep.subr.bf16.mxu0 %v4142_v28  ;;  %2719 = vmatprep.subr.bf16.mxu1 %v4145_v29  ;;  %v1917_v28 = vrot.slane %v1908_v25, %v426_v11  ;;  %v1925_v29 = vrot.slane %v1908_v25, %v434_v12 }
 0x1d5   :  { %2634 = vmatpush1.bf16.msra.mxu0 %v4140_v30  ;;  %2720 = vmatpush1.bf16.msra.mxu1 %v4143_v31 }
 0x1d6   :  { %2635 = vmatprep.subr.bf16.mxu0 %v4148_v32  ;;  %2721 = vmatprep.subr.bf16.mxu1 %v4151_v33 }
 0x1d9   :  { %2636 = vmatpush1.bf16.msra.mxu0 %v4146_v34  ;;  %2722 = vmatpush1.bf16.msra.mxu1 %v4149_v35 }
 0x1da   :  { %2637 = vmatprep.subr.bf16.mxu0 %v4154_v36  ;;  %2723 = vmatprep.subr.bf16.mxu1 %v4157_v37 }
 0x1dd   :  { %2638 = vmatpush1.bf16.msra.mxu0 %v4152_v38  ;;  %2724 = vmatpush1.bf16.msra.mxu1 %v4155_v39 }
 0x1de   :  { %2639 = vmatprep.subr.bf16.mxu0 %v4160_v40  ;;  %2725 = vmatprep.subr.bf16.mxu1 %v4163_v41 }
 0x1e1   :  { %2640 = vmatpush1.bf16.msra.mxu0 %v4158_v19  ;;  %2726 = vmatpush1.bf16.msra.mxu1 %v4161_v20 }
 0x1e2   :  { %2641 = vmatprep.subr.bf16.mxu0 %v4166_v21  ;;  %2727 = vmatprep.subr.bf16.mxu1 %v4169_v22 }
 0x1e5   :  { %2642 = vmatpush1.bf16.msra.mxu0 %v4164_v43  ;;  %2728 = vmatpush1.bf16.msra.mxu1 %v4167_v44 }
 0x1e6   :  { %2643 = vmatprep.subr.bf16.mxu0 %v4172_v45  ;;  %2729 = vmatprep.subr.bf16.mxu1 %v4175_v46 }
 0x1e9   :  { %2644 = vmatpush1.bf16.msra.mxu0 %v4170_v47  ;;  %2730 = vmatpush1.bf16.msra.mxu1 %v4173_v49 }
 0x1ea   :  { %3571 = vmatprep.subr.bf16.mxu0 %v4176_v50  ;;  %3593 = vmatprep.subr.bf16.mxu1 %v4177_v51 }
 0x1ec   :  { %2646 = vmatmul.mubr.bf16.vlgmr.msra.gmra.mrb[4].mxu0 %v5153_v42  ;;  %2732 = vmatmul.mubr.bf16.vlgmr.msra.gmra.mrb[4].mxu1 %v5153_v42  ;;  %v4185_v42 = vld [vmem:[%s5462_s5 + $0xd0] sm:$0xff]  }
 0x1ed   :  { %3572 = vmatpush3.bf16.msra.mxu0 %v4178_v52  ;;  %3594 = vmatpush3.bf16.msra.mxu1 %v4179_v55 }
 0x1ee   :  { %3573 = vmatprep.subr.bf16.mxu0 %v4180_v57  ;;  %3595 = vmatprep.subr.bf16.mxu1 %v4181_v53  ;;  %v3533_v57 = vld [vmem:[%s5463_s6] ss:$0 sm:$0xff] }
 0x1f1   :  { %3574 = vmatpush3.bf16.msra.mxu0 %v4182_v56  ;;  %3596 = vmatpush3.bf16.msra.mxu1 %v4183_v58 }
 0x1f2   :  { %3575 = vmatprep.subr.bf16.mxu0 %v4184_v59  ;;  %3597 = vmatprep.subr.bf16.mxu1 %v4185_v42 }
 0x1f5   :  { %3576 = vmatpush3.bf16.msra.mxu0 %v4186_v60  ;;  %3598 = vmatpush3.bf16.msra.mxu1 %v4187_v61  ;;  %v4210_v61 = vmov 1966171168  }
 0x1f6   :  { %3577 = vmatprep.subr.bf16.mxu0 %v4188_v62  ;;  %3599 = vmatprep.subr.bf16.mxu1 %v4189_v63  ;;  %v3105_v62 = vunpack.c.l.s4 %v4210_v61 }
 0x1f9   :  { %3578 = vmatpush3.bf16.msra.mxu0 %v4190_v0  ;;  %3600 = vmatpush3.bf16.msra.mxu1 %v4191_v1 }
 0x1fa   :  { %3579 = vmatprep.subr.bf16.mxu0 %v4192_v2  ;;  %3601 = vmatprep.subr.bf16.mxu1 %v4193_v3 }
 0x1fd   :  { %3580 = vmatpush3.bf16.msra.mxu0 %v4194_v4  ;;  %3602 = vmatpush3.bf16.msra.mxu1 %v4195_v5 }
 0x1fe   :  { %3581 = vmatprep.subr.bf16.mxu0 %v4196_v6  ;;  %3603 = vmatprep.subr.bf16.mxu1 %v4197_v7  ;;  %v3106_v6 = vunpack.c.0.s8 %v3105_v62 }
 0x201   :  { %3582 = vmatpush3.bf16.msra.mxu0 %v4198_v54  ;;  %3604 = vmatpush3.bf16.msra.mxu1 %v4199_v10 }
 0x202   :  { %3583 = vmatprep.subr.bf16.mxu0 %v4200_v13  ;;  %3605 = vmatprep.subr.bf16.mxu1 %v4201_v14  ;;  %v3109_v13 = vsub.s32 %v3106_v6, %v4383_v48 }
 0x205   :  { %3584 = vmatpush3.bf16.msra.mxu0 %v4202_v15  ;;  %3606 = vmatpush3.bf16.msra.mxu1 %v4203_v16 }
 0x206   :  { %3585 = vmatprep.subr.bf16.mxu0 %v4204_v17  ;;  %3607 = vmatprep.subr.bf16.mxu1 %v4205_v18 }
 0x209   :  { %3586 = vmatpush3.bf16.msra.mxu0 %v4206_v23  ;;  %3608 = vmatpush3.bf16.msra.mxu1 %v4207_v24 }
 0x2bf   :  { %v2647_v30 = vpop.f32.mrb[4].mxu0  ;;  %v2733_v31 = vpop.f32.mrb[4].mxu1 }
 0x2c0   :  { %v3623_v32 = vadd.f32 %v2647_v30, %v1913_v26  ;;  %v3627_v33 = vadd.f32 %v2733_v31, %v1921_v27  ;;  %v2649_v34 = vpop.f32.mrb[5].mxu0  ;;  %v2735_v35 = vpop.f32.mrb[5].mxu1 }
 0x2c1   :  { %v3624_v36 = vadd.f32 %v2649_v34, %v1917_v28  ;;  %v3628_v37 = vadd.f32 %v2735_v35, %v1925_v29  ;;  %v2651_v38 = vpop.f32.mrb[6].mxu0  ;;  %v2737_v39 = vpop.f32.mrb[6].mxu1 }
 0x2c2   :  { %v3625_v8 = vadd.f32 %v2651_v38, %v1913_v26  ;;  %v3629_v40 = vadd.f32 %v2737_v39, %v1921_v27  ;;  %v2653_v41 = vpop.f32.mrb[7].mxu0  ;;  %v2739_v9 = vpop.f32.mrb[7].mxu1  ;;  %v2742_v11 = vmax.f32 %v3623_v32, 0.0  ;;  %v2744_v21 = vmax.f32 %v3627_v33, 0.0 }
 0x2c3   :  { %v3626_v19 = vadd.f32 %v2653_v41, %v1917_v28  ;;  %v3630_v20 = vadd.f32 %v2739_v9, %v1925_v29  ;;  %v2743_v43 = vmax.f32 %v3624_v36, 0.0  ;;  %v2745_v44 = vmax.f32 %v3628_v37, 0.0 }
 0x2c4   :  { %v2746_v22 = vmax.f32 %v3625_v8, 0.0  ;;  %v2748_v12 = vmax.f32 %v3629_v40, 0.0 }
 0x2c5   :  { %v2747_v45 = vmax.f32 %v3626_v19, 0.0  ;;  %v2749_v46 = vmax.f32 %v3630_v20, 0.0 }
 0x2c6   :  { %v2750_v47 = vpack.c.bf16 %v2746_v22, %v2742_v11  ;;  %v2752_v49 = vpack.c.bf16 %v2748_v12, %v2744_v21 }
 0x2c7   :  { %v2751_v50 = vpack.c.bf16 %v2747_v45, %v2743_v43  ;;  %v2753_v51 = vpack.c.bf16 %v2749_v46, %v2745_v44 }
 0x2c9   :  { %3049 = vmatprep.mubr.bf16.mxu0 %v2751_v50  ;;  %3090 = vmatprep.mubr.bf16.mxu1 %v2753_v51 }
 0x2ca   :  { %3050 = vmatmul.mubr.bf16.vlgmr.msra.gmra.mrb[8].mxu0 %v2750_v47  ;;  %3091 = vmatmul.mubr.bf16.vlgmr.msra.gmra.mrb[8].mxu1 %v2752_v49 }
 0x39d   :  { %v3587_v52 = vpop.f32.mrb[8].mxu0  ;;  %v3609_v55 = vpop.f32.mrb[8].mxu1 }
 0x39e   :  { %v3588_v53 = vpop.f32.mrb[9].mxu0  ;;  %v3610_v56 = vpop.f32.mrb[9].mxu1 }
 0x39f   :  { %v3589_v58 = vadd.f32 %v3588_v53, %v3587_v52  ;;  %v3611_v59 = vadd.f32 %v3610_v56, %v3609_v55  ;;  %v3590_v42 = vpop.f32.mrb[10].mxu0  ;;  %v3612_v60 = vpop.f32.mrb[10].mxu1 }
 0x3a0   :  { %v3591_v63 = vpop.f32.mrb[11].mxu0  ;;  %v3613_v0 = vpop.f32.mrb[11].mxu1 }
 0x3a1   :  { %v3052_v1 = vadd.f32 %v3589_v58, %v3533_v57  ;;  %v3592_v2 = vadd.f32 %v3591_v63, %v3590_v42  ;;  %v3614_v3 = vadd.f32 %v3613_v0, %v3612_v60 }
 0x3a3   :  { %v3093_v4 = vadd.f32 %v3611_v59, %v3052_v1  ;;  %v3055_v5 = vadd.f32 %v3592_v2, %v3533_v57 }
 0x3a5   :  { %v3096_v7 = vadd.f32 %v3614_v3, %v3055_v5  ;;  %v3099_v54 = vmax.f32 %v3093_v4, 0.0 }
 0x3a7   :  { %v3100_v10 = vmax.f32 %v3096_v7, 0.0 }
 0x3a9   :  { %v3101_v14 = vpack.c.bf16 %v3100_v10, %v3099_v54 }
 0x3ab   :  { %v3110_v15 = vrot.slane %v3101_v14, %v3109_v13 }
 0x3ad   :  { %3567 = vst.sshfl [vmem:[#allocation2] sm:$0x1 pattern:$0x73625140] %v3110_v15 }
 0x3b4   :  { %v3185_v16 = vld [vmem:[#allocation2] sm:$0x1] }
 0x3b5   :  { %3186 = vst [vmem:[%s5464_s7] sm:$0x1] %v3185_v16 }

</bundles_post_ra>
